<compile_context>
chip_gen: v7x
topology: tpu7x:2x2x1
jax: 0.10.0
libtpu: 0.0.40
codegen_flags: <defaults>
</compile_context>

<pallas_src>
import functools

import jax
import jax.numpy as jnp
from jax.experimental import pallas as pl
from jax.experimental.pallas import tpu as pltpu


def _round_up(x, m):
    return -(-x // m) * m


def _biaffine_kernel(x1_ref, x2t_ref, w_ref, out_ref, *, o_t, d2p):
    # x1_ref : (1, TL1, D1p)  bias ones-column folded into the zero padding
    # x2t_ref: (1, D2p, L2)   pre-transposed; bias ones-row folded into padding
    # w_ref  : (D1p, o_t*D2p) weight slab for this O-chunk
    # out_ref: (1, o_t, TL1, L2)  lane-dense, L2 last
    x1 = x1_ref[0]                       # (TL1, D1p)
    x2t = x2t_ref[0]                     # (D2p, L2)

    # One fused MXU matmul across the whole O-chunk (f32 accumulation).
    aff = jnp.dot(x1, w_ref[...], preferred_element_type=jnp.float32)

    # Short static loop over output channels of this chunk.  D2p is a multiple
    # of 128, so each lane slice is tile-aligned (no relayout copy).
    for o in range(o_t):
        aff_o = aff[:, o * d2p:(o + 1) * d2p].astype(x2t.dtype)   # (TL1, D2p)
        score = jnp.dot(aff_o, x2t, preferred_element_type=jnp.float32)
        out_ref[0, o] = score.astype(out_ref.dtype)


def prepare_biaffine_weight(weight, in1_features, in2_features, out_features,
                            bias=(True, True), compute_dtype=None):
    """Relayout the PyTorch Linear weight (O*(D2+b1), D1+b0) into the kernel's
    (D1p, O*D2p) slab, with the bias rows/columns placed in the 128-alignment
    padding slots.  Pure XLA; cacheable for a fixed parameter."""
    D1, D2, O = in1_features, in2_features, out_features
    d1a = D1 + int(bias[0])
    d2a = D2 + int(bias[1])
    assert weight.shape == (O * d2a, d1a), weight.shape
    d1p = _round_up(d1a, 128)
    d2p = _round_up(d2a, 128)
    w3 = weight.reshape(O, d2a, d1a)                 # [o, d2a, d1a]
    w3 = jnp.transpose(w3, (2, 0, 1))                # (d1a, O, d2a)
    w3 = jnp.pad(w3, ((0, d1p - d1a), (0, 0), (0, d2p - d2a)))
    wap = w3.reshape(d1p, O * d2p)
    if compute_dtype is not None:
        wap = wap.astype(compute_dtype)
    return wap, d1p, d2p


def _choose_l1_tile(L1, B):
    """L1 tile: multiple of 8 (or the full L1), capped at 512.  When B == 1,
    force >= 2 tiles so both v7x TensorCores get a parallel grid step."""
    if L1 <= 8:
        return L1
    tl1 = min(L1, 512)
    if B == 1:
        tl1 = min(tl1, -(-L1 // 2))
    if tl1 < L1:
        tl1 = min(L1, max(8, _round_up(tl1, 8)))
    return tl1


def _choose_o_chunk(O, d1p, d2p, tl1, L2, csz, osz, budget):
    """Largest divisor of O whose per-grid-step VMEM footprint fits `budget`."""
    for o_t in range(O, 0, -1):
        if O % o_t:
            continue
        w_bufs = 1 if o_t == O else 2
        est = (2 * (tl1 * d1p + d2p * L2) * csz      # double-buffered input tiles
               + w_bufs * d1p * o_t * d2p * csz      # weight slab
               + 2 * o_t * tl1 * L2 * osz            # double-buffered output block
               + tl1 * o_t * d2p * 4)                # f32 aff intermediate
        if est <= budget:
            return o_t
    return 1


def biaffine_forward(input1, input2, weight, out_features, bias=(True, True),
                     *, compute_dtype=None, out_dtype=None,
                     channels_last_output=True):
    """weight: PyTorch Linear weight of shape (out_features*(D2+b1), D1+b0)."""
    B, L1, D1 = input1.shape
    B2, L2, D2 = input2.shape
    assert B == B2
    O = out_features
    compute_dtype = jnp.dtype(compute_dtype if compute_dtype is not None
                              else input1.dtype)
    out_dtype = jnp.dtype(out_dtype if out_dtype is not None
                          else input1.dtype)

    wap, d1p, d2p = prepare_biaffine_weight(weight, D1, D2, O, bias,
                                            compute_dtype)

    # Fold the ones-columns into the 128-alignment padding (exact PyTorch
    # ones-augmentation semantics, but every contraction dim stays tile-aligned).
    x1p = jnp.pad(input1, ((0, 0), (0, 0), (0, d1p - D1)))
    if bias[0]:
        x1p = x1p.at[:, :, D1].set(1)
    x1p = x1p.astype(compute_dtype)

    x2p = jnp.pad(input2, ((0, 0), (0, 0), (0, d2p - D2)))
    if bias[1]:
        x2p = x2p.at[:, :, D2].set(1)
    # Pre-transpose: score-matmul RHS arrives MXU-natural (K sublanes, N lanes).
    x2tp = jnp.transpose(x2p, (0, 2, 1)).astype(compute_dtype)   # (B, d2p, L2)

    csz = compute_dtype.itemsize
    osz = out_dtype.itemsize

    tl1 = _choose_l1_tile(L1, B)
    n_l1 = pl.cdiv(L1, tl1)

    try:
        vmem_cap = int(pltpu.get_tpu_info().vmem_capacity_bytes)
    except Exception:
        vmem_cap = 64 << 20     # conservative fallback (v7x per-core)

    o_t = _choose_o_chunk(O, d1p, d2p, tl1, L2, csz, osz, budget=vmem_cap // 2)
    n_o = O // o_t
    single_buffer_w = (n_o == 1)   # constant index map -> no point double-buffering

    w_bufs = 1 if single_buffer_w else 2
    vmem_est = (2 * (tl1 * d1p + d2p * L2) * csz
                + w_bufs * d1p * o_t * d2p * csz
                + 2 * o_t * tl1 * L2 * osz
                + tl1 * o_t * d2p * 4
                + (1 << 20))
    # Generation-aware: raise whenever the estimate needs it, cap at 80% of VMEM.
    vmem_limit = int(min(vmem_cap * 4 // 5, max(32 << 20, int(vmem_est * 1.4))))

    flops = 2 * B * O * (L1 * d1p * d2p + L1 * d2p * L2)
    bytes_accessed = int(n_o * x1p.size * csz + x2tp.size * csz
                         + wap.size * csz + B * O * L1 * L2 * osz)

    kernel = functools.partial(_biaffine_kernel, o_t=o_t, d2p=d2p)

    def build(single_buffer):
        w_kwargs = dict(pipeline_mode=pl.Buffered(1)) if single_buffer else {}
        return pl.pallas_call(
            kernel,
            out_shape=jax.ShapeDtypeStruct((B, O, L1, L2), out_dtype),
            grid_spec=pltpu.PrefetchScalarGridSpec(
                num_scalar_prefetch=0,
                grid=(B, n_o, n_l1),
                in_specs=[
                    pl.BlockSpec((1, tl1, d1p), lambda b, oc, t: (b, t, 0)),
                    pl.BlockSpec((1, d2p, L2), lambda b, oc, t: (b, 0, 0)),
                    pl.BlockSpec((d1p, o_t * d2p), lambda b, oc, t: (0, oc),
                                 **w_kwargs),
                ],
                out_specs=pl.BlockSpec((1, o_t, tl1, L2),
                                       lambda b, oc, t: (b, oc, t, 0)),
            ),
            compiler_params=pltpu.CompilerParams(
                dimension_semantics=("parallel", "parallel", "parallel"),
                vmem_limit_bytes=vmem_limit),
            cost_estimate=pl.CostEstimate(flops=flops, transcendentals=0,
                                          bytes_accessed=bytes_accessed),
        )

    if single_buffer_w:
        try:
            out = build(True)(x1p, x2tp, wap)
        except Exception:
            # pl.Buffered(1) not supported by this runtime: default double-buffer.
            out = build(False)(x1p, x2tp, wap)
    else:
        out = build(False)(x1p, x2tp, wap)

    if channels_last_output:
        # Single XLA permute to the PyTorch output layout (B, L1, L2, O).
        # Pass channels_last_output=False to keep the lane-dense (B, O, L1, L2)
        # layout and save a full HBM round trip when the consumer allows it.
        out = jnp.transpose(out, (0, 2, 3, 1))
    return out


def biaffine_ref(input1, input2, weight, out_features, bias=(True, True)):
    """Pure-JAX reference that mirrors the PyTorch forward line by line."""
    B, L1, D1 = input1.shape
    _, L2, D2 = input2.shape
    if bias[0]:
        input1 = jnp.concatenate(
            [input1, jnp.ones((B, L1, 1), input1.dtype)], axis=2)
        D1 += 1
    if bias[1]:
        input2 = jnp.concatenate(
            [input2, jnp.ones((B, L2, 1), input2.dtype)], axis=2)
        D2 += 1
    affine = jnp.einsum('bid,kd->bik', input1, weight)          # (B, L1, O*D2)
    affine = affine.reshape(B, L1 * out_features, D2)           # (B, L1*O, D2)
    bi = jnp.einsum('bkd,bjd->bkj', affine, input2)             # (B, L1*O, L2)
    bi = jnp.transpose(bi, (0, 2, 1))                           # (B, L2, L1*O)
    bi = bi.reshape(B, L2, L1, out_features)                    # (B, L2, L1, O)
    return jnp.transpose(bi, (0, 2, 1, 3))                      # (B, L1, L2, O)


if __name__ == "__main__":
    # Small shapes consistent with the module: batch=2, seq=8, hidden=32, out=4.
    B, L1, L2 = 2, 8, 8
    in1_features, in2_features, out_features = 32, 32, 4
    bias = (True, True)

    key = jax.random.PRNGKey(0)
    k1, k2, kw = jax.random.split(key, 3)
    input1 = jax.random.normal(k1, (B, L1, in1_features), dtype=jnp.float32)
    input2 = jax.random.normal(k2, (B, L2, in2_features), dtype=jnp.float32)

    # Deterministic init of the Linear weight:
    # shape (out_features*(in2+1), in1+1), no bias.
    lin_out = out_features * (in2_features + int(bias[1]))
    lin_in = in1_features + int(bias[0])
    bound = 1.0 / (lin_in ** 0.5)
    weight = jax.random.uniform(
        kw, (lin_out, lin_in), dtype=jnp.float32, minval=-bound, maxval=bound)

    ref = biaffine_ref(input1, input2, weight, out_features, bias)

    # Full-precision path.
    out = biaffine_forward(input1, input2, weight, out_features, bias)
    out = jax.block_until_ready(out)
    assert out.shape == (B, L1, L2, out_features), out.shape
    assert jnp.allclose(out, ref, atol=1e-4, rtol=1e-4), (
        float(jnp.max(jnp.abs(out - ref))))

    # bf16-MXU path (operands in bf16, f32 accumulation / f32 output).
    out_bf = biaffine_forward(input1, input2, weight, out_features, bias,
                              compute_dtype=jnp.bfloat16, out_dtype=jnp.float32)
    out_bf = jax.block_until_ready(out_bf)
    max_err = float(jnp.max(jnp.abs(out_bf - ref)))
    scale = float(jnp.max(jnp.abs(ref)))
    assert max_err <= 0.1 * scale + 0.1, (max_err, scale)

    print("KERNEL_OK")
</pallas_src>

<mosaic_0001>
module attributes {stable_mosaic.version = 11 : i64} {
  func.func @_biaffine_kernel(%arg0: i32, %arg1: i32, %arg2: i32, %arg3: memref<1x8x128xf32, #tpu.memory_space<vmem>>, %arg4: memref<1x128x8xf32, #tpu.memory_space<vmem>>, %arg5: memref<128x512xf32, #tpu.memory_space<vmem>>, %arg6: memref<1x4x8x8xf32, #tpu.memory_space<vmem>>) attributes {dimension_semantics = [#tpu.dimension_semantics<parallel>, #tpu.dimension_semantics<parallel>, #tpu.dimension_semantics<parallel>], iteration_bounds = array<i64: 2, 1, 1>, scalar_prefetch = 0 : i64, scratch_operands = 0 : i64, tpu.core_type = #tpu.core_type<tc>, window_params = [{transform_indices = @transform_0, window_bounds = array<i64: 1, 8, 128>}, {transform_indices = @transform_1, window_bounds = array<i64: 1, 128, 8>}, {pipeline_mode = #tpu.pipeline_mode<synchronous>, transform_indices = @transform_2, window_bounds = array<i64: 128, 512>}, {transform_indices = @transform_3, window_bounds = array<i64: 1, 4, 8, 8>}]} {
    %c0 = arith.constant 0 : index
    %c0_0 = arith.constant 0 : index
    %c0_1 = arith.constant 0 : index
    %0 = vector.load %arg3[%c0, %c0_0, %c0_1] : memref<1x8x128xf32, #tpu.memory_space<vmem>>, vector<1x8x128xf32>
    %1 = vector.shape_cast %0 : vector<1x8x128xf32> to vector<8x128xf32>
    %c0_2 = arith.constant 0 : index
    %c0_3 = arith.constant 0 : index
    %c0_4 = arith.constant 0 : index
    %2 = vector.load %arg4[%c0_2, %c0_3, %c0_4] : memref<1x128x8xf32, #tpu.memory_space<vmem>>, vector<1x128x8xf32>
    %3 = vector.shape_cast %2 : vector<1x128x8xf32> to vector<128x8xf32>
    %c0_5 = arith.constant 0 : index
    %c0_6 = arith.constant 0 : index
    %4 = vector.load %arg5[%c0_5, %c0_6] : memref<128x512xf32, #tpu.memory_space<vmem>>, vector<128x512xf32>
    %cst = arith.constant dense<0.000000e+00> : vector<8x512xf32>
    %5 = tpu.matmul %1, %4, %cst {dimension_numbers = #tpu.dot_dimension_numbers<[1], [0], [0], [1], [0, 0, 1, 1], [], []>} : vector<8x128xf32>, vector<128x512xf32>, vector<8x512xf32> -> vector<8x512xf32>
    %6 = vector.extract_strided_slice %5 {offsets = [0, 0], sizes = [8, 128], strides = [1, 1]} : vector<8x512xf32> to vector<8x128xf32>
    %cst_7 = arith.constant dense<0.000000e+00> : vector<8x8xf32>
    %7 = tpu.matmul %6, %3, %cst_7 {dimension_numbers = #tpu.dot_dimension_numbers<[1], [0], [0], [1], [0, 0, 1, 1], [], []>} : vector<8x128xf32>, vector<128x8xf32>, vector<8x8xf32> -> vector<8x8xf32>
    %c0_8 = arith.constant 0 : index
    %c0_9 = arith.constant 0 : index
    %c0_10 = arith.constant 0 : index
    %c0_11 = arith.constant 0 : index
    %8 = vector.load %arg6[%c0_8, %c0_9, %c0_10, %c0_11] : memref<1x4x8x8xf32, #tpu.memory_space<vmem>>, vector<1x1x8x8xf32>
    %9 = vector.shape_cast %8 : vector<1x1x8x8xf32> to vector<8x8xf32>
    %10 = vector.shape_cast %7 : vector<8x8xf32> to vector<1x1x8x8xf32>
    tpu.vector_store %arg6[%c0_8, %c0_9, %c0_10, %c0_11], %10 {strides = array<i32>} : memref<1x4x8x8xf32, #tpu.memory_space<vmem>>, vector<1x1x8x8xf32>,
    %11 = vector.extract_strided_slice %5 {offsets = [0, 128], sizes = [8, 128], strides = [1, 1]} : vector<8x512xf32> to vector<8x128xf32>
    %cst_12 = arith.constant dense<0.000000e+00> : vector<8x8xf32>
    %12 = tpu.matmul %11, %3, %cst_12 {dimension_numbers = #tpu.dot_dimension_numbers<[1], [0], [0], [1], [0, 0, 1, 1], [], []>} : vector<8x128xf32>, vector<128x8xf32>, vector<8x8xf32> -> vector<8x8xf32>
    %c0_13 = arith.constant 0 : index
    %c1 = arith.constant 1 : index
    %c0_14 = arith.constant 0 : index
    %c0_15 = arith.constant 0 : index
    %13 = vector.load %arg6[%c0_13, %c1, %c0_14, %c0_15] : memref<1x4x8x8xf32, #tpu.memory_space<vmem>>, vector<1x1x8x8xf32>
    %14 = vector.shape_cast %13 : vector<1x1x8x8xf32> to vector<8x8xf32>
    %15 = vector.shape_cast %12 : vector<8x8xf32> to vector<1x1x8x8xf32>
    tpu.vector_store %arg6[%c0_13, %c1, %c0_14, %c0_15], %15 {strides = array<i32>} : memref<1x4x8x8xf32, #tpu.memory_space<vmem>>, vector<1x1x8x8xf32>,
    %16 = vector.extract_strided_slice %5 {offsets = [0, 256], sizes = [8, 128], strides = [1, 1]} : vector<8x512xf32> to vector<8x128xf32>
    %cst_16 = arith.constant dense<0.000000e+00> : vector<8x8xf32>
    %17 = tpu.matmul %16, %3, %cst_16 {dimension_numbers = #tpu.dot_dimension_numbers<[1], [0], [0], [1], [0, 0, 1, 1], [], []>} : vector<8x128xf32>, vector<128x8xf32>, vector<8x8xf32> -> vector<8x8xf32>
    %c0_17 = arith.constant 0 : index
    %c2 = arith.constant 2 : index
    %c0_18 = arith.constant 0 : index
    %c0_19 = arith.constant 0 : index
    %18 = vector.load %arg6[%c0_17, %c2, %c0_18, %c0_19] : memref<1x4x8x8xf32, #tpu.memory_space<vmem>>, vector<1x1x8x8xf32>
    %19 = vector.shape_cast %18 : vector<1x1x8x8xf32> to vector<8x8xf32>
    %20 = vector.shape_cast %17 : vector<8x8xf32> to vector<1x1x8x8xf32>
    tpu.vector_store %arg6[%c0_17, %c2, %c0_18, %c0_19], %20 {strides = array<i32>} : memref<1x4x8x8xf32, #tpu.memory_space<vmem>>, vector<1x1x8x8xf32>,
    %21 = vector.extract_strided_slice %5 {offsets = [0, 384], sizes = [8, 128], strides = [1, 1]} : vector<8x512xf32> to vector<8x128xf32>
    %cst_20 = arith.constant dense<0.000000e+00> : vector<8x8xf32>
    %22 = tpu.matmul %21, %3, %cst_20 {dimension_numbers = #tpu.dot_dimension_numbers<[1], [0], [0], [1], [0, 0, 1, 1], [], []>} : vector<8x128xf32>, vector<128x8xf32>, vector<8x8xf32> -> vector<8x8xf32>
    %c0_21 = arith.constant 0 : index
    %c3 = arith.constant 3 : index
    %c0_22 = arith.constant 0 : index
    %c0_23 = arith.constant 0 : index
    %23 = vector.load %arg6[%c0_21, %c3, %c0_22, %c0_23] : memref<1x4x8x8xf32, #tpu.memory_space<vmem>>, vector<1x1x8x8xf32>
    %24 = vector.shape_cast %23 : vector<1x1x8x8xf32> to vector<8x8xf32>
    %25 = vector.shape_cast %22 : vector<8x8xf32> to vector<1x1x8x8xf32>
    tpu.vector_store %arg6[%c0_21, %c3, %c0_22, %c0_23], %25 {strides = array<i32>} : memref<1x4x8x8xf32, #tpu.memory_space<vmem>>, vector<1x1x8x8xf32>,
    return
  }
  func.func @transform_0(%arg0: i32, %arg1: i32, %arg2: i32) -> (i32, i32, i32) {
    %c0_i32 = arith.constant 0 : i32
    %c0_i32_0 = arith.constant 0 : i32
    return %arg0, %arg2, %c0_i32 : i32, i32, i32
  }
  func.func @transform_1(%arg0: i32, %arg1: i32, %arg2: i32) -> (i32, i32, i32) {
    %c0_i32 = arith.constant 0 : i32
    %c0_i32_0 = arith.constant 0 : i32
    %c0_i32_1 = arith.constant 0 : i32
    return %arg0, %c0_i32, %c0_i32_0 : i32, i32, i32
  }
  func.func @transform_2(%arg0: i32, %arg1: i32, %arg2: i32) -> (i32, i32) {
    %c0_i32 = arith.constant 0 : i32
    %c0_i32_0 = arith.constant 0 : i32
    return %c0_i32, %arg1 : i32, i32
  }
  func.func @transform_3(%arg0: i32, %arg1: i32, %arg2: i32) -> (i32, i32, i32, i32) {
    %c0_i32 = arith.constant 0 : i32
    %c0_i32_0 = arith.constant 0 : i32
    return %arg0, %arg1, %arg2, %c0_i32 : i32, i32, i32, i32
  }
}

module attributes {stable_mosaic.version = 11 : i64} {
  func.func @_biaffine_kernel(%arg0: i32, %arg1: i32, %arg2: i32, %arg3: memref<1x8x128xf32, #tpu.memory_space<vmem>>, %arg4: memref<1x128x8xf32, #tpu.memory_space<vmem>>, %arg5: memref<128x512xf32, #tpu.memory_space<vmem>>, %arg6: memref<1x4x8x8xf32, #tpu.memory_space<vmem>>) attributes {dimension_semantics = [#tpu.dimension_semantics<parallel>, #tpu.dimension_semantics<parallel>, #tpu.dimension_semantics<parallel>], iteration_bounds = array<i64: 2, 1, 1>, scalar_prefetch = 0 : i64, scratch_operands = 0 : i64, tpu.core_type = #tpu.core_type<tc>, window_params = [{transform_indices = @transform_0, window_bounds = array<i64: 1, 8, 128>}, {transform_indices = @transform_1, window_bounds = array<i64: 1, 128, 8>}, {transform_indices = @transform_2, window_bounds = array<i64: 128, 512>}, {transform_indices = @transform_3, window_bounds = array<i64: 1, 4, 8, 8>}]} {
    %c0 = arith.constant 0 : index
    %c0_0 = arith.constant 0 : index
    %c0_1 = arith.constant 0 : index
    %0 = vector.load %arg3[%c0, %c0_0, %c0_1] : memref<1x8x128xf32, #tpu.memory_space<vmem>>, vector<1x8x128xf32>
    %1 = vector.shape_cast %0 : vector<1x8x128xf32> to vector<8x128xf32>
    %c0_2 = arith.constant 0 : index
    %c0_3 = arith.constant 0 : index
    %c0_4 = arith.constant 0 : index
    %2 = vector.load %arg4[%c0_2, %c0_3, %c0_4] : memref<1x128x8xf32, #tpu.memory_space<vmem>>, vector<1x128x8xf32>
    %3 = vector.shape_cast %2 : vector<1x128x8xf32> to vector<128x8xf32>
    %c0_5 = arith.constant 0 : index
    %c0_6 = arith.constant 0 : index
    %4 = vector.load %arg5[%c0_5, %c0_6] : memref<128x512xf32, #tpu.memory_space<vmem>>, vector<128x512xf32>
    %cst = arith.constant dense<0.000000e+00> : vector<8x512xf32>
    %5 = tpu.matmul %1, %4, %cst {dimension_numbers = #tpu.dot_dimension_numbers<[1], [0], [0], [1], [0, 0, 1, 1], [], []>} : vector<8x128xf32>, vector<128x512xf32>, vector<8x512xf32> -> vector<8x512xf32>
    %6 = vector.extract_strided_slice %5 {offsets = [0, 0], sizes = [8, 128], strides = [1, 1]} : vector<8x512xf32> to vector<8x128xf32>
    %cst_7 = arith.constant dense<0.000000e+00> : vector<8x8xf32>
    %7 = tpu.matmul %6, %3, %cst_7 {dimension_numbers = #tpu.dot_dimension_numbers<[1], [0], [0], [1], [0, 0, 1, 1], [], []>} : vector<8x128xf32>, vector<128x8xf32>, vector<8x8xf32> -> vector<8x8xf32>
    %c0_8 = arith.constant 0 : index
    %c0_9 = arith.constant 0 : index
    %c0_10 = arith.constant 0 : index
    %c0_11 = arith.constant 0 : index
    %8 = vector.load %arg6[%c0_8, %c0_9, %c0_10, %c0_11] : memref<1x4x8x8xf32, #tpu.memory_space<vmem>>, vector<1x1x8x8xf32>
    %9 = vector.shape_cast %8 : vector<1x1x8x8xf32> to vector<8x8xf32>
    %10 = vector.shape_cast %7 : vector<8x8xf32> to vector<1x1x8x8xf32>
    tpu.vector_store %arg6[%c0_8, %c0_9, %c0_10, %c0_11], %10 {strides = array<i32>} : memref<1x4x8x8xf32, #tpu.memory_space<vmem>>, vector<1x1x8x8xf32>,
    %11 = vector.extract_strided_slice %5 {offsets = [0, 128], sizes = [8, 128], strides = [1, 1]} : vector<8x512xf32> to vector<8x128xf32>
    %cst_12 = arith.constant dense<0.000000e+00> : vector<8x8xf32>
    %12 = tpu.matmul %11, %3, %cst_12 {dimension_numbers = #tpu.dot_dimension_numbers<[1], [0], [0], [1], [0, 0, 1, 1], [], []>} : vector<8x128xf32>, vector<128x8xf32>, vector<8x8xf32> -> vector<8x8xf32>
    %c0_13 = arith.constant 0 : index
    %c1 = arith.constant 1 : index
    %c0_14 = arith.constant 0 : index
    %c0_15 = arith.constant 0 : index
    %13 = vector.load %arg6[%c0_13, %c1, %c0_14, %c0_15] : memref<1x4x8x8xf32, #tpu.memory_space<vmem>>, vector<1x1x8x8xf32>
    %14 = vector.shape_cast %13 : vector<1x1x8x8xf32> to vector<8x8xf32>
    %15 = vector.shape_cast %12 : vector<8x8xf32> to vector<1x1x8x8xf32>
    tpu.vector_store %arg6[%c0_13, %c1, %c0_14, %c0_15], %15 {strides = array<i32>} : memref<1x4x8x8xf32, #tpu.memory_space<vmem>>, vector<1x1x8x8xf32>,
    %16 = vector.extract_strided_slice %5 {offsets = [0, 256], sizes = [8, 128], strides = [1, 1]} : vector<8x512xf32> to vector<8x128xf32>
    %cst_16 = arith.constant dense<0.000000e+00> : vector<8x8xf32>
    %17 = tpu.matmul %16, %3, %cst_16 {dimension_numbers = #tpu.dot_dimension_numbers<[1], [0], [0], [1], [0, 0, 1, 1], [], []>} : vector<8x128xf32>, vector<128x8xf32>, vector<8x8xf32> -> vector<8x8xf32>
    %c0_17 = arith.constant 0 : index
    %c2 = arith.constant 2 : index
    %c0_18 = arith.constant 0 : index
    %c0_19 = arith.constant 0 : index
    %18 = vector.load %arg6[%c0_17, %c2, %c0_18, %c0_19] : memref<1x4x8x8xf32, #tpu.memory_space<vmem>>, vector<1x1x8x8xf32>
    %19 = vector.shape_cast %18 : vector<1x1x8x8xf32> to vector<8x8xf32>
    %20 = vector.shape_cast %17 : vector<8x8xf32> to vector<1x1x8x8xf32>
    tpu.vector_store %arg6[%c0_17, %c2, %c0_18, %c0_19], %20 {strides = array<i32>} : memref<1x4x8x8xf32, #tpu.memory_space<vmem>>, vector<1x1x8x8xf32>,
    %21 = vector.extract_strided_slice %5 {offsets = [0, 384], sizes = [8, 128], strides = [1, 1]} : vector<8x512xf32> to vector<8x128xf32>
    %cst_20 = arith.constant dense<0.000000e+00> : vector<8x8xf32>
    %22 = tpu.matmul %21, %3, %cst_20 {dimension_numbers = #tpu.dot_dimension_numbers<[1], [0], [0], [1], [0, 0, 1, 1], [], []>} : vector<8x128xf32>, vector<128x8xf32>, vector<8x8xf32> -> vector<8x8xf32>
    %c0_21 = arith.constant 0 : index
    %c3 = arith.constant 3 : index
    %c0_22 = arith.constant 0 : index
    %c0_23 = arith.constant 0 : index
    %23 = vector.load %arg6[%c0_21, %c3, %c0_22, %c0_23] : memref<1x4x8x8xf32, #tpu.memory_space<vmem>>, vector<1x1x8x8xf32>
    %24 = vector.shape_cast %23 : vector<1x1x8x8xf32> to vector<8x8xf32>
    %25 = vector.shape_cast %22 : vector<8x8xf32> to vector<1x1x8x8xf32>
    tpu.vector_store %arg6[%c0_21, %c3, %c0_22, %c0_23], %25 {strides = array<i32>} : memref<1x4x8x8xf32, #tpu.memory_space<vmem>>, vector<1x1x8x8xf32>,
    return
  }
  func.func @transform_0(%arg0: i32, %arg1: i32, %arg2: i32) -> (i32, i32, i32) {
    %c0_i32 = arith.constant 0 : i32
    %c0_i32_0 = arith.constant 0 : i32
    return %arg0, %arg2, %c0_i32 : i32, i32, i32
  }
  func.func @transform_1(%arg0: i32, %arg1: i32, %arg2: i32) -> (i32, i32, i32) {
    %c0_i32 = arith.constant 0 : i32
    %c0_i32_0 = arith.constant 0 : i32
    %c0_i32_1 = arith.constant 0 : i32
    return %arg0, %c0_i32, %c0_i32_0 : i32, i32, i32
  }
  func.func @transform_2(%arg0: i32, %arg1: i32, %arg2: i32) -> (i32, i32) {
    %c0_i32 = arith.constant 0 : i32
    %c0_i32_0 = arith.constant 0 : i32
    return %c0_i32, %arg1 : i32, i32
  }
  func.func @transform_3(%arg0: i32, %arg1: i32, %arg2: i32) -> (i32, i32, i32, i32) {
    %c0_i32 = arith.constant 0 : i32
    %c0_i32_0 = arith.constant 0 : i32
    return %arg0, %arg1, %arg2, %c0_i32 : i32, i32, i32, i32
  }
}

</mosaic_0001>

<bundles_post_ra>
// kernel: tpu_custom_call.1
= control target key start
LH: loop header
LB: loop body
LE: loop exit
PB: predicated region body
PF: predicated region fallthrough
CT: control target
= control target key end

     0   :  { %8 = vsyncpa [#allocation3], 0  ;;  %s1724_s0 = inlined_call_operand.vmem [shape: f32[2,8,128], index: 0, kind: input, shape index: {}]   ;;  %s1725_s1 = inlined_call_operand.vmem [shape: f32[2,128,8], index: 1, kind: input, shape index: {}]   ;;  %s1726_s2 = inlined_call_operand.hbm [shape: f32[128,512], index: 2, kind: input, shape index: {}]   ;;  %s1727_s3 = inlined_call_operand.hbm [shape: f32[2,4,8,8], index: 3, kind: output, shape index: {}]  }
   0x1   :  { %9 = vsyncpa [#allocation4], 0 }
   0x2   :  { %11 = vsyncpa [#allocation4 + $0x1], 0  ;;  %s1482_s12 = smov 0   ;;  %s1484_s13 = smov 0  }
   0x3   :  { %s1486_s14 = smov 0   ;;  %s1488_s15 = smov 0  }
   0x4   :  { %s1490_s16 = smov 0   ;;  %s1492_s17 = smov 0  }
   0x5 LB: > { %s879_s18 = sadd.s32 4294967295, %s1451_s17   ;;  %s880_s19 = sadd.s32 4294967294, %s1451_s17   ;;  %s1451_s17 = sphi %s1492_s17, %s17_s17   ;;  %s1447_s16 = sphi %s1490_s16, %s1745_s16   ;;  %s1443_s15 = sphi %s1488_s15, %s1744_s15   ;;  %s1439_s14 = sphi %s1486_s14, %s1743_s14   ;;  %s1435_s13 = sphi %s1484_s13, %s1742_s13   ;;  %s1431_s12 = sphi %s1482_s12, %s1741_s12  }
   0x6   : > { %s36_s20 = sadd.s32 1, %s1447_s16  ;;  %s127_s21 = sadd.s32 1, %s1439_s14 }
   0x7   : > { %p38_p0 = scmp.ge.s32.totalorder %s36_s20, 2  ;;  %p137_p1 = scmp.ne.s32.totalorder %s1439_s14, %s1435_s13 }
   0x8   : > { %p138_p2 = scmp.eq.s32.totalorder %s879_s18, 1  ;;  %p143_p3 = scmp.ne.s32.totalorder %s1435_s13, %s1431_s12 }
   0x9   : > { %s1747_s20 = smov (%p38_p0, %s36_s20), 0  ;;  %p144_p5 = scmp.eq.s32.totalorder %s880_s19, 1 }
   0xa   : > { %p1522_p4 = por %p138_p2, %p137_p1  ;;  %s120_s23 = ssub.s32 %s1447_s16, %s1747_s20 }
   0xb   : > { %p881_p6 = scmp.ge.s32.totalorder %s1451_s17, 1  ;;  %p125_p7 = scmp.eq.s32.totalorder %s120_s23, 0 }
   0xc   : > { %s1732_s22 = scalar_select %p1522_p4, 1, 0 }
   0xd   : > { %p1529_p8 = por %p144_p5, %p143_p3  ;;  %p151_p9 = scmp.lt.s32.totalorder %s1451_s17, 3 }
   0xe   : > { %s1535_s25 = scalar_select %p125_p7, %s1439_s14, %s127_s21  }
   0xf   : > { %s1733_s24 = scalar_select %p1529_p8, 1, 0 }
  0x10   : > { %p1537_p10 = pnand %p881_p6, %p151_p9  ;;  %p1541_p11 = scmp.eq.s32.totalorder %s879_s18, 0 }
  0x11   : > { %s1453_s28 = smov [#allocation2]   ;;  %s1341_s6 = scalar_lea.hbm %s1726_s2, 8192 }
  0x12   : > { %s1734_s26 = scalar_select %p1537_p10, 1, 0 }
  0x13   : > { %s1735_s27 = scalar_select %p1541_p11, 1, 0 }
  0x14   : > { %p1274_p12 = pneg %p1537_p10  ;;  %s166_s29 = sshll.u32 %s1453_s28, 4  ;;  %s167_s29 = int_to_ptr.vmem [resolvable:$true] %s166_s29 }
  0x15   : > { %p1342_p0 = scmp.ne.s32.totalorder %s1726_s2, %s1341_s6  ;;  %p1348_p5 = scmp.lt.u32.totalorder %s1341_s6, %s1726_s2 }
  0x16   : > { %p1549_p13 = pnand %p1541_p11, %p1274_p12 }
  0x18   : > { %p1343_p1 = pneg %p1549_p13 }
  0x1a   : > { %p1344_p2 = pnand %p1343_p1, %p1342_p0 }
  0x1c   : > { %p1345_p3 = pneg %p1344_p2 }
  0x1e   : > { %p1350_p6 = pnand %p1348_p5, %p1345_p3 }
  0x20   : > { %1353 = shalt.err (!%p1350_p6)
}
  0x21   : > { %s1354_s11 = scalar_lea.vmem %s167_s29, 8192  ;;  %p1362_p8 = scmp.lt.s32.totalorder %s167_s29, %s167_s29 }
  0x22   : > { %p1355_p7 = scmp.ne.s32.totalorder %s167_s29, %s1354_s11  ;;  %p1363_p4 = scmp.lt.s32.totalorder %s1354_s11, %s1354_s11 }
  0x24   : > { %p1357_p9 = pnand %p1355_p7, %p1343_p1  ;;  %p1364_p11 = por %p1363_p4, %p1362_p8 }
  0x26   : > { %p1358_p12 = pneg %p1357_p9 }
  0x28   : > { %p1365_p10 = pnand %p1364_p11, %p1358_p12 }
  0x2a   : > { %1368 = shalt.err (!%p1365_p10)
}
  0x2b   : > { %s1454_s18 = smov 512   ;;  %s1455_s19 = smov 32  }
  0x2c   : > { %1277 = dma.hbm_to_vmem [thread:$0]  (!%p1549_p13), %s1726_s2, 8192, %s167_s29, [#allocation3], %s1454_s18, %s1454_s18, %s1455_s19  }
  0x2d   : > { %p1737_p0 = scmp.ne.s32.totalorder %s1734_s26, 0 }
  0x2e   : > { %p1738_p2 = scmp.ne.s32.totalorder (!%p1737_p0), %s1735_s27, 0 }
  0x2f   : > { %200 = sbr.rel (%p1737_p0) target bundleno = 563 (0x233), region = 32 }
  0x36   : > { %1422 = dma.done.wait (%p1738_p2), [#allocation3], 8192  }
  0x37   : > { %1424 = vsyncadd (%p1738_p2), [#allocation3], 4294959104  ;;  %v1456_v0 = vmov 0.0   ;;  %v263_v1 = vld [vmem:[#allocation2 + $0x8] sm:$0xff]  ;;  %v262_v3 = vld [vmem:[#allocation2] sm:$0xff]  ;;  %p231_p4 = scmp.lt.s32.totalorder %s1443_s15, 1 }
  0x38   : > { %390 = vmatprep.mubr.f32.mxu0 %v1456_v0  ;;  %461 = vmatprep.mubr.f32.mxu1 %v1456_v0  ;;  %v267_v2 = vld [vmem:[#allocation2 + $0x28] sm:$0xff]  ;;  %v266_v5 = vld [vmem:[#allocation2 + $0x20] sm:$0xff]  ;;  %v265_v26 = vld [vmem:[#allocation2 + $0x18] sm:$0xff]  ;;  %vm1458_vm0 = vmmov 0   ;;  %s228_s8 = sand.u32 1, %s1435_s13   ;;  %vm538_vm1 = vcmask 64512  }
  0x39   : > { %v1108_v4 = vpack.c.bf16 %v267_v2, %v263_v1  ;;  %v271_v6 = vld [vmem:[#allocation2 + $0x48] sm:$0xff]  ;;  %v1110_v8 = vpack.c.bf16 %v266_v5, %v262_v3  ;;  %v270_v10 = vld [vmem:[#allocation2 + $0x40] sm:$0xff]  ;;  %v269_v28 = vld [vmem:[#allocation2 + $0x38] sm:$0xff]  ;;  %s232_s26 = scalar_select %p231_p4, %s1443_s15, 1 }
  0x3a   : > { %v275_v7 = vld [vmem:[#allocation2 + $0x68] sm:$0xff]  ;;  %v274_v11 = vld [vmem:[#allocation2 + $0x60] sm:$0xff]  ;;  %v264_v29 = vld [vmem:[#allocation2 + $0x10] sm:$0xff]  ;;  %v1140_v33 = vpack.c.bf16 %v269_v28, %v265_v26  ;;  %s886_s9 = sshll.u32 %s228_s8, 5  ;;  %s899_s18 = sshll.u32 %s1443_s15, 9 }
  0x3b   : > { %v1112_v9 = vpack.c.bf16 %v275_v7, %v271_v6  ;;  %v279_v12 = vld [vmem:[#allocation2 + $0x88] sm:$0xff]  ;;  %1109 = vmatprep.subr.bf16.mxu0 %v1108_v4  ;;  %v1114_v14 = vpack.c.bf16 %v274_v11, %v270_v10  ;;  %v278_v16 = vld [vmem:[#allocation2 + $0x80] sm:$0xff]  ;;  %v268_v30 = vld [vmem:[#allocation2 + $0x30] sm:$0xff]  ;;  %s898_s27 = sshll.u32 %s232_s26, 7  ;;  %s887_s28 = sshll.u32 %s232_s26, 3 }
  0x3c   : > { %v283_v13 = vld [vmem:[#allocation2 + $0xa8] sm:$0xff]  ;;  %1111 = vmatpush1.bf16.msra.mxu0 %v1110_v8  ;;  %v282_v17 = vld [vmem:[#allocation2 + $0xa0] sm:$0xff]  ;;  %v1142_v34 = vpack.c.bf16 %v268_v30, %v264_v29  ;;  %v273_v35 = vld [vmem:[#allocation2 + $0x58] sm:$0xff]  ;;  %1141 = vmatprep.subr.bf16.mxu1 %v1140_v33  ;;  %s1584_s4 = scalar_lea.vmem %s1725_s1, %s898_s27  ;;  %s237_s7 = scalar_lea.vmem %s1724_s0, %s887_s28  ;;  %v1457_v33 = vmov 0.0|0.0  }
  0x3d   : > { %1113 = vmatprep.subr.bf16.mxu0 %v1112_v9  ;;  %v1116_v15 = vpack.c.bf16 %v283_v13, %v279_v12  ;;  %v287_v18 = vld [vmem:[#allocation2 + $0xc8] sm:$0xff]  ;;  %v1118_v20 = vpack.c.bf16 %v282_v17, %v278_v16  ;;  %v286_v22 = vld [vmem:[#allocation2 + $0xc0] sm:$0xff]  ;;  %v277_v36 = vld [vmem:[#allocation2 + $0x78] sm:$0xff]  ;;  %s230_s10 = scalar_lea.vmem [#allocation5], %s886_s9  ;;  %s1674_s23 = scalar_lea.hbm %s1727_s3, %s899_s18 }
  0x3e   : > { %v291_v19 = vld [vmem:[#allocation2 + $0xe8] sm:$0xff]  ;;  %v290_v23 = vld [vmem:[#allocation2 + $0xe0] sm:$0xff]  ;;  %v1144_v38 = vpack.c.bf16 %v277_v36, %v273_v35  ;;  %v272_v39 = vld [vmem:[#allocation2 + $0x50] sm:$0xff]  ;;  %1143 = vmatpush1.bf16.msra.mxu1 %v1142_v34  ;;  %s773_s11 = sshll.u32 %s230_s10, 4  ;;  %s1678_s26 = scalar_lea.sflag [#allocation4], %s228_s8  ;;  %s1669_s11 = int_to_ptr.vmem [resolvable:$true] %s773_s11 }
  0x3f   : > { %v1120_v21 = vpack.c.bf16 %v291_v19, %v287_v18  ;;  %v295_v24 = vld [vmem:[#allocation2 + $0x108] sm:$0xff]  ;;  %v294_v27 = vld [vmem:[#allocation2 + $0x100] sm:$0xff]  ;;  %v1122_v31 = vpack.c.bf16 %v290_v23, %v286_v22  ;;  %v276_v40 = vld [vmem:[#allocation2 + $0x70] sm:$0xff]  ;;  %s1369_s15 = scalar_lea.vmem %s1669_s11, 512  ;;  %p1739_p10 = scmp.ne.s32.totalorder %s1732_s22, 0 }
  0x40   : > { %1115 = vmatpush1.bf16.msra.mxu0 %v1114_v14  ;;  %v299_v25 = vld [vmem:[#allocation2 + $0x128] sm:$0xff]  ;;  %v298_v32 = vld [vmem:[#allocation2 + $0x120] sm:$0xff]  ;;  %v281_v41 = vld [vmem:[#allocation2 + $0x98] sm:$0xff]  ;;  %v1146_v45 = vpack.c.bf16 %v276_v40, %v272_v39  ;;  %1145 = vmatprep.subr.bf16.mxu1 %v1144_v38  ;;  %p1370_p8 = scmp.ne.s32.totalorder %s1669_s11, %s1369_s15  ;;  %s1459_s27 = smov [#allocation5]  }
  0x41   : > { %1117 = vmatprep.subr.bf16.mxu0 %v1116_v15  ;;  %v1124_v37 = vpack.c.bf16 %v299_v25, %v295_v24  ;;  %v303_v42 = vld [vmem:[#allocation2 + $0x148] sm:$0xff]  ;;  %v285_v44 = vld [vmem:[#allocation2 + $0xb8] sm:$0xff]  ;;  %v1126_v46 = vpack.c.bf16 %v298_v32, %v294_v27  ;;  %v302_v47 = vld [vmem:[#allocation2 + $0x140] sm:$0xff]  ;;  %s1373_s28 = sshll.u32 %s1459_s27, 4  ;;  %s1374_s28 = int_to_ptr.vmem [resolvable:$false] %s1373_s28 }
  0x42   : > { %v307_v43 = vld [vmem:[#allocation2 + $0x168] sm:$0xff]  ;;  %v1148_v48 = vpack.c.bf16 %v285_v44, %v281_v41  ;;  %v280_v49 = vld [vmem:[#allocation2 + $0x90] sm:$0xff]  ;;  %v306_v52 = vld [vmem:[#allocation2 + $0x160] sm:$0xff]  ;;  %1147 = vmatpush1.bf16.msra.mxu1 %v1146_v45  ;;  %p1371_p11 = pnand %p1370_p8, %p1739_p10  ;;  %s1375_s29 = scalar_lea.vmem %s1374_s28, 1024 }
  0x43   : > { %v284_v50 = vld [vmem:[#allocation2 + $0xb0] sm:$0xff]  ;;  %v1128_v51 = vpack.c.bf16 %v307_v43, %v303_v42  ;;  %v289_v53 = vld [vmem:[#allocation2 + $0xd8] sm:$0xff]  ;;  %v311_v55 = vld [vmem:[#allocation2 + $0x188] sm:$0xff]  ;;  %v1130_v58 = vpack.c.bf16 %v306_v52, %v302_v47  ;;  %p1376_p1 = scmp.lt.s32.totalorder %s1669_s11, %s1374_s28  ;;  %p1377_p3 = scmp.lt.s32.totalorder %s1375_s29, %s1369_s15 }
  0x44   : > { %1119 = vmatpush1.bf16.msra.mxu0 %v1118_v20  ;;  %v293_v54 = vld [vmem:[#allocation2 + $0xf8] sm:$0xff]  ;;  %v315_v56 = vld [vmem:[#allocation2 + $0x1a8] sm:$0xff]  ;;  %v1150_v57 = vpack.c.bf16 %v284_v50, %v280_v49  ;;  %v310_v59 = vld [vmem:[#allocation2 + $0x180] sm:$0xff]  ;;  %1149 = vmatprep.subr.bf16.mxu1 %v1148_v48  ;;  %p1372_p13 = pneg %p1371_p11 }
  0x45   : > { %1121 = vmatprep.subr.bf16.mxu0 %v1120_v21  ;;  %v1152_v60 = vpack.c.bf16 %v293_v54, %v289_v53  ;;  %v288_v61 = vld [vmem:[#allocation2 + $0xd0] sm:$0xff]  ;;  %v1132_v63 = vpack.c.bf16 %v315_v56, %v311_v55  ;;  %v314_v1 = vld [vmem:[#allocation2 + $0x1a0] sm:$0xff]  ;;  %v297_v2 = vld [vmem:[#allocation2 + $0x118] sm:$0xff]  ;;  %p1378_p5 = por %p1377_p3, %p1376_p1 }
  0x46   : > { %v292_v62 = vld [vmem:[#allocation2 + $0xf0] sm:$0xff]  ;;  %v301_v3 = vld [vmem:[#allocation2 + $0x138] sm:$0xff]  ;;  %v319_v4 = vld [vmem:[#allocation2 + $0x1c8] sm:$0xff]  ;;  %1151 = vmatpush1.bf16.msra.mxu1 %v1150_v57  ;;  %v1134_v7 = vpack.c.bf16 %v314_v1, %v310_v59 }
  0x47   : > { %v323_v5 = vld [vmem:[#allocation2 + $0x1e8] sm:$0xff]  ;;  %v1154_v6 = vpack.c.bf16 %v292_v62, %v288_v61  ;;  %v318_v8 = vld [vmem:[#allocation2 + $0x1c0] sm:$0xff]  ;;  %1153 = vmatprep.subr.bf16.mxu1 %v1152_v60  ;;  %v1156_v9 = vpack.c.bf16 %v301_v3, %v297_v2  ;;  %v296_v10 = vld [vmem:[#allocation2 + $0x110] sm:$0xff]  ;;  %p1379_p6 = pnand %p1378_p5, %p1372_p13 }
  0x48   : > { %1123 = vmatpush1.bf16.msra.mxu0 %v1122_v31  ;;  %v300_v11 = vld [vmem:[#allocation2 + $0x130] sm:$0xff]  ;;  %v1136_v12 = vpack.c.bf16 %v323_v5, %v319_v4  ;;  %v322_v13 = vld [vmem:[#allocation2 + $0x1e0] sm:$0xff]  ;;  %v305_v14 = vld [vmem:[#allocation2 + $0x158] sm:$0xff] }
  0x49   : > { %1125 = vmatprep.subr.bf16.mxu0 %v1124_v37  ;;  %v309_v15 = vld [vmem:[#allocation2 + $0x178] sm:$0xff]  ;;  %v1158_v16 = vpack.c.bf16 %v300_v11, %v296_v10  ;;  %v1138_v17 = vpack.c.bf16 %v322_v13, %v318_v8  ;;  %v304_v19 = vld [vmem:[#allocation2 + $0x150] sm:$0xff]  ;;  %v246_v23 = vld [vmem:[%s1584_s4] sm:$0xff] }
  0x4a   : > { %1155 = vmatpush1.bf16.msra.mxu1 %v1154_v6  ;;  %v1160_v18 = vpack.c.bf16 %v309_v15, %v305_v14  ;;  %v308_v20 = vld [vmem:[#allocation2 + $0x170] sm:$0xff]  ;;  %v313_v21 = vld [vmem:[#allocation2 + $0x198] sm:$0xff]  ;;  %v247_v24 = vld [vmem:[%s1584_s4 + $0x8] sm:$0xff] }
  0x4b   : > { %1157 = vmatprep.subr.bf16.mxu1 %v1156_v9  ;;  %v317_v22 = vld [vmem:[#allocation2 + $0x1b8] sm:$0xff]  ;;  %v245_v25 = vld [vmem:[%s237_s7] sm:$0xff]  ;;  %v1162_v26 = vpack.c.bf16 %v308_v20, %v304_v19  ;;  %v312_v28 = vld [vmem:[#allocation2 + $0x190] sm:$0xff]  ;;  %v1591_v31 = vpack.c.bf16 %v247_v24, %v246_v23 }
  0x4c   : > { %1127 = vmatpush1.bf16.msra.mxu0 %v1126_v46  ;;  %v1164_v27 = vpack.c.bf16 %v317_v22, %v313_v21  ;;  %v316_v29 = vld [vmem:[#allocation2 + $0x1b0] sm:$0xff]  ;;  %v321_v30 = vld [vmem:[#allocation2 + $0x1d8] sm:$0xff]  ;;  %v250_v41 = vld [vmem:[%s1584_s4 + $0x20] sm:$0xff] }
  0x4d   : > { %1129 = vmatprep.subr.bf16.mxu0 %v1128_v51  ;;  %v325_v32 = vld [vmem:[#allocation2 + $0x1f8] sm:$0xff]  ;;  %v248_v34 = vld [vmem:[%s1584_s4 + $0x10] sm:$0xff]  ;;  %v1166_v36 = vpack.c.bf16 %v316_v29, %v312_v28  ;;  %v251_v42 = vld [vmem:[%s1584_s4 + $0x28] sm:$0xff] }
  0x4e   : > { %1159 = vmatpush1.bf16.msra.mxu1 %v1158_v16  ;;  %v249_v35 = vld [vmem:[%s1584_s4 + $0x18] sm:$0xff]  ;;  %v1168_v37 = vpack.c.bf16 %v325_v32, %v321_v30  ;;  %v320_v38 = vld [vmem:[#allocation2 + $0x1d0] sm:$0xff]  ;;  %v1603_v44 = vpack.c.bf16 %v251_v42, %v250_v41  ;;  %v254_v48 = vld [vmem:[%s1584_s4 + $0x40] sm:$0xff] }
  0x4f   : > { %1161 = vmatprep.subr.bf16.mxu1 %v1160_v18  ;;  %v324_v39 = vld [vmem:[#allocation2 + $0x1f0] sm:$0xff]  ;;  %v1597_v40 = vpack.c.bf16 %v249_v35, %v248_v34  ;;  %v253_v46 = vld [vmem:[%s1584_s4 + $0x38] sm:$0xff]  ;;  %v255_v49 = vld [vmem:[%s1584_s4 + $0x48] sm:$0xff] }
  0x50   : > { %1131 = vmatpush1.bf16.msra.mxu0 %v1130_v58  ;;  %v1170_v43 = vpack.c.bf16 %v324_v39, %v320_v38  ;;  %v252_v45 = vld [vmem:[%s1584_s4 + $0x30] sm:$0xff]  ;;  %v1185_v50 = vpack.c.bf16 %v255_v49, %v254_v48  ;;  %v257_v52 = vld [vmem:[%s1584_s4 + $0x58] sm:$0xff]  ;;  %v258_v54 = vld [vmem:[%s1584_s4 + $0x60] sm:$0xff] }
  0x51   : > { %1133 = vmatprep.subr.bf16.mxu0 %v1132_v63  ;;  %v1610_v47 = vpack.c.bf16 %v253_v46, %v252_v45  ;;  %v256_v51 = vld [vmem:[%s1584_s4 + $0x50] sm:$0xff]  ;;  %v259_v55 = vld [vmem:[%s1584_s4 + $0x68] sm:$0xff]  ;;  %v261_v58 = vld [vmem:[%s1584_s4 + $0x78] sm:$0xff] }
  0x52   : > { %1163 = vmatpush1.bf16.msra.mxu1 %v1162_v26  ;;  %v1188_v53 = vpack.c.bf16 %v257_v52, %v256_v51  ;;  %v1191_v56 = vpack.c.bf16 %v259_v55, %v258_v54  ;;  %v260_v57 = vld [vmem:[%s1584_s4 + $0x70] sm:$0xff] }
  0x53   : > { %1165 = vmatprep.subr.bf16.mxu1 %v1164_v27  ;;  %v1194_v59 = vpack.c.bf16 %v261_v58, %v260_v57 }
  0x54   : > { %1135 = vmatpush1.bf16.msra.mxu0 %v1134_v7 }
  0x55   : > { %1137 = vmatprep.subr.bf16.mxu0 %v1136_v12 }
  0x56   : > { %1167 = vmatpush1.bf16.msra.mxu1 %v1166_v36 }
  0x57   : > { %1169 = vmatprep.subr.bf16.mxu1 %v1168_v37 }
  0x58   : > { %1139 = vmatpush1.bf16.msra.mxu0 %v1138_v17 }
  0x59   : > { %1172 = vmatprep.subr.bf16.mxu0 %v1457_v33 }
  0x5a   : > { %1171 = vmatpush1.bf16.msra.mxu1 %v1170_v43 }
  0x5b   : > { %391 = vmatmul.mubr.f32.vlgmr.msra.gmra.mrb[0].mxu0 %v245_v25  ;;  %1196 = vmatprep.subr.bf16.mxu1 %v1457_v33 }
  0x5c   : > { %1174 = vmatpush3.bf16.msra.mxu0 %v1591_v31  ;;  %1000 = vmatprep.mubr.msk.f32.mxu0 %vm1458_vm0, %v1456_v0 }
  0x5d   : > { %1175 = vmatprep.subr.bf16.mxu0 %v1457_v33  ;;  %462 = vmatmul.mubr.f32.vlgmr.msra.gmra.mrb[0].mxu1 %v245_v25 }
  0x5e   : > { %1198 = vmatpush3.bf16.msra.mxu1 %v1591_v31  ;;  %1035 = vmatprep.mubr.msk.f32.mxu1 %vm1458_vm0, %v1456_v0 }
  0x5f   : > { %1199 = vmatprep.subr.bf16.mxu1 %v1457_v33 }
  0x60   : > { %1177 = vmatpush3.bf16.msra.mxu0 %v1597_v40 }
  0x61   : > { %1178 = vmatprep.subr.bf16.mxu0 %v1457_v33 }
  0x62   : > { %1201 = vmatpush3.bf16.msra.mxu1 %v1597_v40 }
  0x63   : > { %1202 = vmatprep.subr.bf16.mxu1 %v1457_v33 }
  0x64   : > { %1180 = vmatpush3.bf16.msra.mxu0 %v1603_v44 }
  0x65   : > { %1181 = vmatprep.subr.bf16.mxu0 %v1457_v33 }
  0x66   : > { %1204 = vmatpush3.bf16.msra.mxu1 %v1603_v44 }
  0x67   : > { %1205 = vmatprep.subr.bf16.mxu1 %v1457_v33 }
  0x68   : > { %1183 = vmatpush3.bf16.msra.mxu0 %v1610_v47 }
  0x69   : > { %1184 = vmatprep.subr.bf16.mxu0 %v1457_v33 }
  0x6a   : > { %1207 = vmatpush3.bf16.msra.mxu1 %v1610_v47 }
  0x6b   : > { %1208 = vmatprep.subr.bf16.mxu1 %v1457_v33 }
  0x6c   : > { %1186 = vmatpush3.bf16.msra.mxu0 %v1185_v50 }
  0x6d   : > { %1187 = vmatprep.subr.bf16.mxu0 %v1457_v33 }
  0x6e   : > { %1210 = vmatpush3.bf16.msra.mxu1 %v1185_v50 }
  0x6f   : > { %1211 = vmatprep.subr.bf16.mxu1 %v1457_v33 }
  0x70   : > { %1189 = vmatpush3.bf16.msra.mxu0 %v1188_v53 }
  0x71   : > { %1190 = vmatprep.subr.bf16.mxu0 %v1457_v33 }
  0x72   : > { %1213 = vmatpush3.bf16.msra.mxu1 %v1188_v53 }
  0x73   : > { %1214 = vmatprep.subr.bf16.mxu1 %v1457_v33 }
  0x74   : > { %1192 = vmatpush3.bf16.msra.mxu0 %v1191_v56 }
  0x75   : > { %1193 = vmatprep.subr.bf16.mxu0 %v1457_v33 }
  0x76   : > { %1216 = vmatpush3.bf16.msra.mxu1 %v1191_v56 }
  0x77   : > { %1217 = vmatprep.subr.bf16.mxu1 %v1457_v33 }
  0x78   : > { %1195 = vmatpush3.bf16.msra.mxu0 %v1194_v59 }
  0x79   : > { %1220 = vmatprep.subr.bf16.mxu0 %v1457_v33 }
  0x7a   : > { %1219 = vmatpush3.bf16.msra.mxu1 %v1194_v59 }
  0x7b   : > { %1244 = vmatprep.subr.bf16.mxu1 %v1457_v33 }
 0x12e   : > { %v392_v60 = vpop.f32.mrb[0].mxu0 }
 0x12f   : > { %v394_v61 = vpop.f32.mrb[1].mxu0  ;;  %1001 = vmatmul.mubr.f32.vlgmr.msra.gmra.mrb[2].mxu0 %v392_v60 }
 0x130   : > { %1222 = vmatpush3.bf16.msra.mxu0 %v1591_v31  ;;  %1036 = vmatmul.mubr.f32.vlgmr.msra.gmra.mrb[2].mxu1 %v394_v61  ;;  %v463_v62 = vpop.f32.mrb[0].mxu1 }
 0x131   : > { %1246 = vmatpush3.bf16.msra.mxu1 %v1591_v31  ;;  %1223 = vmatprep.subr.bf16.mxu0 %v1457_v33  ;;  %v465_v63 = vpop.f32.mrb[1].mxu1 }
 0x132   : > { %1247 = vmatprep.subr.bf16.mxu1 %v1457_v33  ;;  %1070 = vmatprep.mubr.msk.f32.mxu0 %vm1458_vm0, %v1456_v0 }
 0x133   : > { %1105 = vmatprep.mubr.msk.f32.mxu1 %vm1458_vm0, %v1456_v0 }
 0x134   : > { %1225 = vmatpush3.bf16.msra.mxu0 %v1597_v40 }
 0x135   : > { %1249 = vmatpush3.bf16.msra.mxu1 %v1597_v40  ;;  %1226 = vmatprep.subr.bf16.mxu0 %v1457_v33 }
 0x136   : > { %1250 = vmatprep.subr.bf16.mxu1 %v1457_v33 }
 0x138   : > { %1228 = vmatpush3.bf16.msra.mxu0 %v1603_v44 }
 0x139   : > { %1252 = vmatpush3.bf16.msra.mxu1 %v1603_v44  ;;  %1229 = vmatprep.subr.bf16.mxu0 %v1457_v33 }
 0x13a   : > { %1253 = vmatprep.subr.bf16.mxu1 %v1457_v33 }
 0x13c   : > { %1231 = vmatpush3.bf16.msra.mxu0 %v1610_v47 }
 0x13d   : > { %1255 = vmatpush3.bf16.msra.mxu1 %v1610_v47  ;;  %1232 = vmatprep.subr.bf16.mxu0 %v1457_v33 }
 0x13e   : > { %1256 = vmatprep.subr.bf16.mxu1 %v1457_v33 }
 0x140   : > { %1234 = vmatpush3.bf16.msra.mxu0 %v1185_v50 }
 0x141   : > { %1258 = vmatpush3.bf16.msra.mxu1 %v1185_v50  ;;  %1235 = vmatprep.subr.bf16.mxu0 %v1457_v33 }
 0x142   : > { %1259 = vmatprep.subr.bf16.mxu1 %v1457_v33 }
 0x144   : > { %1237 = vmatpush3.bf16.msra.mxu0 %v1188_v53 }
 0x145   : > { %1261 = vmatpush3.bf16.msra.mxu1 %v1188_v53  ;;  %1238 = vmatprep.subr.bf16.mxu0 %v1457_v33 }
 0x146   : > { %1262 = vmatprep.subr.bf16.mxu1 %v1457_v33 }
 0x148   : > { %1240 = vmatpush3.bf16.msra.mxu0 %v1191_v56 }
 0x149   : > { %1264 = vmatpush3.bf16.msra.mxu1 %v1191_v56  ;;  %1241 = vmatprep.subr.bf16.mxu0 %v1457_v33 }
 0x14a   : > { %1265 = vmatprep.subr.bf16.mxu1 %v1457_v33 }
 0x14c   : > { %1243 = vmatpush3.bf16.msra.mxu0 %v1194_v59 }
 0x14d   : > { %1267 = vmatpush3.bf16.msra.mxu1 %v1194_v59 }
 0x14f   : > { %1071 = vmatmul.mubr.f32.vlgmr.msra.gmra.mrb[4].mxu0 %v463_v62 }
 0x150   : > { %1106 = vmatmul.mubr.f32.vlgmr.msra.gmra.mrb[4].mxu1 %v465_v63 }
 0x202   : > { %v534_v0 = vpop.f32.mrb[2].mxu0 }
 0x203   : > { %539 = vst.msk [vmem:[%s230_s10] sm:$0xff] %vm538_vm1, %v534_v0  ;;  %v1002_v1 = vpop.f32.mrb[3].mxu0  ;;  %v606_v2 = vpop.f32.mrb[2].mxu1 }
 0x204   : > { %890 = vst.msk [vmem:[%s230_s10 + $0x8] sm:$0xff] %vm538_vm1, %v606_v2  ;;  %v1037_v3 = vpop.f32.mrb[3].mxu1 }
 0x222   : > { %v678_v4 = vpop.f32.mrb[4].mxu0 }
 0x223   : > { %891 = vst.msk [vmem:[%s230_s10 + $0x10] sm:$0xff] %vm538_vm1, %v678_v4  ;;  %v1072_v5 = vpop.f32.mrb[5].mxu0  ;;  %v750_v6 = vpop.f32.mrb[4].mxu1 }
 0x224   : > { %892 = vst.msk [vmem:[%s230_s10 + $0x18] sm:$0xff] %vm538_vm1, %v750_v6  ;;  %v1107_v7 = vpop.f32.mrb[5].mxu1 }
 0x225   : > { %1382 = shalt.err (!%p1379_p6)
}
 0x226   : > { %s1383_s30 = scalar_lea.hbm %s1674_s23, 512  ;;  %s1387_s6 = scalar_lea.hbm %s1727_s3, 1024 }
 0x227   : > { %p1384_p7 = scmp.ne.s32.totalorder %s1674_s23, %s1383_s30  ;;  %p1388_p0 = scmp.lt.u32.totalorder %s1674_s23, %s1727_s3 }
 0x228   : > { %p1389_p2 = scmp.lt.u32.totalorder %s1387_s6, %s1383_s30  ;;  %p1391_p8 = scmp.lt.u32.totalorder %s1383_s30, %s1674_s23 }
 0x229   : > { %p1385_p9 = pnand %p1384_p7, %p1739_p10 }
 0x22a   : > { %p1390_p4 = por %p1389_p2, %p1388_p0 }
 0x22b   : > { %p1386_p12 = pneg %p1385_p9 }
 0x22c   : > { %p1392_p11 = por %p1391_p8, %p1390_p4 }
 0x22e   : > { %p1393_p13 = pnand %p1392_p11, %p1386_p12 }
 0x230   : > { %1396 = shalt.err (!%p1393_p13)
}
 0x231   : > { %s1460_s9 = smov 128   ;;  %s1461_s10 = smov 8  }
 0x232   : > { %1272 = dma.vmem_to_hbm [thread:$0]  (%p1739_p10), %s1669_s11, 512, %s1674_s23, %s1678_s26, %s1460_s9, %s1460_s9, %s1461_s10  }
 0x233 PF: > { %p1284_p1 = scmp.ge.s32.totalorder %s1451_s17, 2  ;;  %s788_s18 = sand.u32 1, %s1431_s12  }
 0x234   : > { %p1740_p3 = scmp.ne.s32.totalorder %s1733_s24, 0  ;;  %s789_s19 = scalar_lea.sflag [#allocation4], %s788_s18 }
 0x236   : > { %p1279_p5 = pnand %p1284_p1, %p1740_p3 }
 0x238   : > { %1426 = dma.done.wait (!%p1279_p5), %s789_s19, 512  }
 0x239   : > { %1428 = vsyncadd (!%p1279_p5), %s789_s19, 4294966784  ;;  %s17_s17 = sadd.s32 1, %s1451_s17   ;;  %s1741_s12 = smov %s1435_s13 }
 0x23a   : > { %p14_p6 = scmp.ge.s32.totalorder %s17_s17, 4   ;;  %s1742_s13 = smov %s1439_s14 }
 0x23b   : > { %s1743_s14 = smov %s1535_s25  ;;  %s1744_s15 = smov %s1447_s16 }
 0x23c   : > { %s1745_s16 = smov %s1747_s20  ;;  %16 = sbr.rel (!%p14_p6) target bundleno = 5 (0x5), region = 79 }
 0x243   :  { %794 = vsyncpa [#allocation3], 1 }
 0x244   :  { %796 = vsyncpa [#allocation3 + $0x1], 1 }
 0x245   :  { %797 = vsyncpa [#allocation4], 1 }
 0x246   :  { %799 = vsyncpa [#allocation4 + $0x1], 1 }

// kernel: tpu_custom_call.1
= control target key start
LH: loop header
LB: loop body
LE: loop exit
PB: predicated region body
PF: predicated region fallthrough
CT: control target
= control target key end

     0   :  { %8 = vsyncpa [#allocation3], 0  ;;  %s1724_s0 = inlined_call_operand.vmem [shape: f32[2,8,128], index: 0, kind: input, shape index: {}]   ;;  %s1725_s1 = inlined_call_operand.vmem [shape: f32[2,128,8], index: 1, kind: input, shape index: {}]   ;;  %s1726_s2 = inlined_call_operand.hbm [shape: f32[128,512], index: 2, kind: input, shape index: {}]   ;;  %s1727_s3 = inlined_call_operand.hbm [shape: f32[2,4,8,8], index: 3, kind: output, shape index: {}]  }
   0x1   :  { %9 = vsyncpa [#allocation4], 0 }
   0x2   :  { %11 = vsyncpa [#allocation4 + $0x1], 0  ;;  %s1482_s12 = smov 0   ;;  %s1484_s13 = smov 0  }
   0x3   :  { %s1486_s14 = smov 0   ;;  %s1488_s15 = smov 0  }
   0x4   :  { %s1490_s16 = smov 0   ;;  %s1492_s17 = smov 0  }
   0x5 LB: > { %s879_s18 = sadd.s32 4294967295, %s1451_s17   ;;  %s880_s19 = sadd.s32 4294967294, %s1451_s17   ;;  %s1451_s17 = sphi %s1492_s17, %s17_s17   ;;  %s1447_s16 = sphi %s1490_s16, %s1745_s16   ;;  %s1443_s15 = sphi %s1488_s15, %s1744_s15   ;;  %s1439_s14 = sphi %s1486_s14, %s1743_s14   ;;  %s1435_s13 = sphi %s1484_s13, %s1742_s13   ;;  %s1431_s12 = sphi %s1482_s12, %s1741_s12  }
   0x6   : > { %s36_s20 = sadd.s32 1, %s1447_s16  ;;  %s127_s21 = sadd.s32 1, %s1439_s14 }
   0x7   : > { %p38_p0 = scmp.ge.s32.totalorder %s36_s20, 2  ;;  %p137_p1 = scmp.ne.s32.totalorder %s1439_s14, %s1435_s13 }
   0x8   : > { %p138_p2 = scmp.eq.s32.totalorder %s879_s18, 1  ;;  %p143_p3 = scmp.ne.s32.totalorder %s1435_s13, %s1431_s12 }
   0x9   : > { %s1747_s20 = smov (%p38_p0, %s36_s20), 0  ;;  %p144_p5 = scmp.eq.s32.totalorder %s880_s19, 1 }
   0xa   : > { %p1522_p4 = por %p138_p2, %p137_p1  ;;  %s120_s23 = ssub.s32 %s1447_s16, %s1747_s20 }
   0xb   : > { %p881_p6 = scmp.ge.s32.totalorder %s1451_s17, 1  ;;  %p125_p7 = scmp.eq.s32.totalorder %s120_s23, 0 }
   0xc   : > { %s1732_s22 = scalar_select %p1522_p4, 1, 0 }
   0xd   : > { %p1529_p8 = por %p144_p5, %p143_p3  ;;  %p151_p9 = scmp.lt.s32.totalorder %s1451_s17, 3 }
   0xe   : > { %s1535_s25 = scalar_select %p125_p7, %s1439_s14, %s127_s21  }
   0xf   : > { %s1733_s24 = scalar_select %p1529_p8, 1, 0 }
  0x10   : > { %p1537_p10 = pnand %p881_p6, %p151_p9  ;;  %p1541_p11 = scmp.eq.s32.totalorder %s879_s18, 0 }
  0x11   : > { %s1453_s28 = smov [#allocation2]   ;;  %s1341_s6 = scalar_lea.hbm %s1726_s2, 8192 }
  0x12   : > { %s1734_s26 = scalar_select %p1537_p10, 1, 0 }
  0x13   : > { %s1735_s27 = scalar_select %p1541_p11, 1, 0 }
  0x14   : > { %p1274_p12 = pneg %p1537_p10  ;;  %s166_s29 = sshll.u32 %s1453_s28, 4  ;;  %s167_s29 = int_to_ptr.vmem [resolvable:$true] %s166_s29 }
  0x15   : > { %p1342_p0 = scmp.ne.s32.totalorder %s1726_s2, %s1341_s6  ;;  %p1348_p5 = scmp.lt.u32.totalorder %s1341_s6, %s1726_s2 }
  0x16   : > { %p1549_p13 = pnand %p1541_p11, %p1274_p12 }
  0x18   : > { %p1343_p1 = pneg %p1549_p13 }
  0x1a   : > { %p1344_p2 = pnand %p1343_p1, %p1342_p0 }
  0x1c   : > { %p1345_p3 = pneg %p1344_p2 }
  0x1e   : > { %p1350_p6 = pnand %p1348_p5, %p1345_p3 }
  0x20   : > { %1353 = shalt.err (!%p1350_p6)
}
  0x21   : > { %s1354_s11 = scalar_lea.vmem %s167_s29, 8192  ;;  %p1362_p8 = scmp.lt.s32.totalorder %s167_s29, %s167_s29 }
  0x22   : > { %p1355_p7 = scmp.ne.s32.totalorder %s167_s29, %s1354_s11  ;;  %p1363_p4 = scmp.lt.s32.totalorder %s1354_s11, %s1354_s11 }
  0x24   : > { %p1357_p9 = pnand %p1355_p7, %p1343_p1  ;;  %p1364_p11 = por %p1363_p4, %p1362_p8 }
  0x26   : > { %p1358_p12 = pneg %p1357_p9 }
  0x28   : > { %p1365_p10 = pnand %p1364_p11, %p1358_p12 }
  0x2a   : > { %1368 = shalt.err (!%p1365_p10)
}
  0x2b   : > { %s1454_s18 = smov 512   ;;  %s1455_s19 = smov 32  }
  0x2c   : > { %1277 = dma.hbm_to_vmem [thread:$0]  (!%p1549_p13), %s1726_s2, 8192, %s167_s29, [#allocation3], %s1454_s18, %s1454_s18, %s1455_s19  }
  0x2d   : > { %p1737_p0 = scmp.ne.s32.totalorder %s1734_s26, 0 }
  0x2e   : > { %p1738_p2 = scmp.ne.s32.totalorder (!%p1737_p0), %s1735_s27, 0 }
  0x2f   : > { %200 = sbr.rel (%p1737_p0) target bundleno = 563 (0x233), region = 32 }
  0x36   : > { %1422 = dma.done.wait (%p1738_p2), [#allocation3], 8192  }
  0x37   : > { %1424 = vsyncadd (%p1738_p2), [#allocation3], 4294959104  ;;  %v1456_v0 = vmov 0.0   ;;  %v263_v1 = vld [vmem:[#allocation2 + $0x8] sm:$0xff]  ;;  %v262_v3 = vld [vmem:[#allocation2] sm:$0xff]  ;;  %p231_p4 = scmp.lt.s32.totalorder %s1443_s15, 1 }
  0x38   : > { %390 = vmatprep.mubr.f32.mxu0 %v1456_v0  ;;  %461 = vmatprep.mubr.f32.mxu1 %v1456_v0  ;;  %v267_v2 = vld [vmem:[#allocation2 + $0x28] sm:$0xff]  ;;  %v266_v5 = vld [vmem:[#allocation2 + $0x20] sm:$0xff]  ;;  %v265_v26 = vld [vmem:[#allocation2 + $0x18] sm:$0xff]  ;;  %vm1458_vm0 = vmmov 0   ;;  %s228_s8 = sand.u32 1, %s1435_s13   ;;  %vm538_vm1 = vcmask 64512  }
  0x39   : > { %v1108_v4 = vpack.c.bf16 %v267_v2, %v263_v1  ;;  %v271_v6 = vld [vmem:[#allocation2 + $0x48] sm:$0xff]  ;;  %v1110_v8 = vpack.c.bf16 %v266_v5, %v262_v3  ;;  %v270_v10 = vld [vmem:[#allocation2 + $0x40] sm:$0xff]  ;;  %v269_v28 = vld [vmem:[#allocation2 + $0x38] sm:$0xff]  ;;  %s232_s26 = scalar_select %p231_p4, %s1443_s15, 1 }
  0x3a   : > { %v275_v7 = vld [vmem:[#allocation2 + $0x68] sm:$0xff]  ;;  %v274_v11 = vld [vmem:[#allocation2 + $0x60] sm:$0xff]  ;;  %v264_v29 = vld [vmem:[#allocation2 + $0x10] sm:$0xff]  ;;  %v1140_v33 = vpack.c.bf16 %v269_v28, %v265_v26  ;;  %s886_s9 = sshll.u32 %s228_s8, 5  ;;  %s899_s18 = sshll.u32 %s1443_s15, 9 }
  0x3b   : > { %v1112_v9 = vpack.c.bf16 %v275_v7, %v271_v6  ;;  %v279_v12 = vld [vmem:[#allocation2 + $0x88] sm:$0xff]  ;;  %1109 = vmatprep.subr.bf16.mxu0 %v1108_v4  ;;  %v1114_v14 = vpack.c.bf16 %v274_v11, %v270_v10  ;;  %v278_v16 = vld [vmem:[#allocation2 + $0x80] sm:$0xff]  ;;  %v268_v30 = vld [vmem:[#allocation2 + $0x30] sm:$0xff]  ;;  %s898_s27 = sshll.u32 %s232_s26, 7  ;;  %s887_s28 = sshll.u32 %s232_s26, 3 }
  0x3c   : > { %v283_v13 = vld [vmem:[#allocation2 + $0xa8] sm:$0xff]  ;;  %1111 = vmatpush1.bf16.msra.mxu0 %v1110_v8  ;;  %v282_v17 = vld [vmem:[#allocation2 + $0xa0] sm:$0xff]  ;;  %v1142_v34 = vpack.c.bf16 %v268_v30, %v264_v29  ;;  %v273_v35 = vld [vmem:[#allocation2 + $0x58] sm:$0xff]  ;;  %1141 = vmatprep.subr.bf16.mxu1 %v1140_v33  ;;  %s1584_s4 = scalar_lea.vmem %s1725_s1, %s898_s27  ;;  %s237_s7 = scalar_lea.vmem %s1724_s0, %s887_s28  ;;  %v1457_v33 = vmov 0.0|0.0  }
  0x3d   : > { %1113 = vmatprep.subr.bf16.mxu0 %v1112_v9  ;;  %v1116_v15 = vpack.c.bf16 %v283_v13, %v279_v12  ;;  %v287_v18 = vld [vmem:[#allocation2 + $0xc8] sm:$0xff]  ;;  %v1118_v20 = vpack.c.bf16 %v282_v17, %v278_v16  ;;  %v286_v22 = vld [vmem:[#allocation2 + $0xc0] sm:$0xff]  ;;  %v277_v36 = vld [vmem:[#allocation2 + $0x78] sm:$0xff]  ;;  %s230_s10 = scalar_lea.vmem [#allocation5], %s886_s9  ;;  %s1674_s23 = scalar_lea.hbm %s1727_s3, %s899_s18 }
  0x3e   : > { %v291_v19 = vld [vmem:[#allocation2 + $0xe8] sm:$0xff]  ;;  %v290_v23 = vld [vmem:[#allocation2 + $0xe0] sm:$0xff]  ;;  %v1144_v38 = vpack.c.bf16 %v277_v36, %v273_v35  ;;  %v272_v39 = vld [vmem:[#allocation2 + $0x50] sm:$0xff]  ;;  %1143 = vmatpush1.bf16.msra.mxu1 %v1142_v34  ;;  %s773_s11 = sshll.u32 %s230_s10, 4  ;;  %s1678_s26 = scalar_lea.sflag [#allocation4], %s228_s8  ;;  %s1669_s11 = int_to_ptr.vmem [resolvable:$true] %s773_s11 }
  0x3f   : > { %v1120_v21 = vpack.c.bf16 %v291_v19, %v287_v18  ;;  %v295_v24 = vld [vmem:[#allocation2 + $0x108] sm:$0xff]  ;;  %v294_v27 = vld [vmem:[#allocation2 + $0x100] sm:$0xff]  ;;  %v1122_v31 = vpack.c.bf16 %v290_v23, %v286_v22  ;;  %v276_v40 = vld [vmem:[#allocation2 + $0x70] sm:$0xff]  ;;  %s1369_s15 = scalar_lea.vmem %s1669_s11, 512  ;;  %p1739_p10 = scmp.ne.s32.totalorder %s1732_s22, 0 }
  0x40   : > { %1115 = vmatpush1.bf16.msra.mxu0 %v1114_v14  ;;  %v299_v25 = vld [vmem:[#allocation2 + $0x128] sm:$0xff]  ;;  %v298_v32 = vld [vmem:[#allocation2 + $0x120] sm:$0xff]  ;;  %v281_v41 = vld [vmem:[#allocation2 + $0x98] sm:$0xff]  ;;  %v1146_v45 = vpack.c.bf16 %v276_v40, %v272_v39  ;;  %1145 = vmatprep.subr.bf16.mxu1 %v1144_v38  ;;  %p1370_p8 = scmp.ne.s32.totalorder %s1669_s11, %s1369_s15  ;;  %s1459_s27 = smov [#allocation5]  }
  0x41   : > { %1117 = vmatprep.subr.bf16.mxu0 %v1116_v15  ;;  %v1124_v37 = vpack.c.bf16 %v299_v25, %v295_v24  ;;  %v303_v42 = vld [vmem:[#allocation2 + $0x148] sm:$0xff]  ;;  %v285_v44 = vld [vmem:[#allocation2 + $0xb8] sm:$0xff]  ;;  %v1126_v46 = vpack.c.bf16 %v298_v32, %v294_v27  ;;  %v302_v47 = vld [vmem:[#allocation2 + $0x140] sm:$0xff]  ;;  %s1373_s28 = sshll.u32 %s1459_s27, 4  ;;  %s1374_s28 = int_to_ptr.vmem [resolvable:$false] %s1373_s28 }
  0x42   : > { %v307_v43 = vld [vmem:[#allocation2 + $0x168] sm:$0xff]  ;;  %v1148_v48 = vpack.c.bf16 %v285_v44, %v281_v41  ;;  %v280_v49 = vld [vmem:[#allocation2 + $0x90] sm:$0xff]  ;;  %v306_v52 = vld [vmem:[#allocation2 + $0x160] sm:$0xff]  ;;  %1147 = vmatpush1.bf16.msra.mxu1 %v1146_v45  ;;  %p1371_p11 = pnand %p1370_p8, %p1739_p10  ;;  %s1375_s29 = scalar_lea.vmem %s1374_s28, 1024 }
  0x43   : > { %v284_v50 = vld [vmem:[#allocation2 + $0xb0] sm:$0xff]  ;;  %v1128_v51 = vpack.c.bf16 %v307_v43, %v303_v42  ;;  %v289_v53 = vld [vmem:[#allocation2 + $0xd8] sm:$0xff]  ;;  %v311_v55 = vld [vmem:[#allocation2 + $0x188] sm:$0xff]  ;;  %v1130_v58 = vpack.c.bf16 %v306_v52, %v302_v47  ;;  %p1376_p1 = scmp.lt.s32.totalorder %s1669_s11, %s1374_s28  ;;  %p1377_p3 = scmp.lt.s32.totalorder %s1375_s29, %s1369_s15 }
  0x44   : > { %1119 = vmatpush1.bf16.msra.mxu0 %v1118_v20  ;;  %v293_v54 = vld [vmem:[#allocation2 + $0xf8] sm:$0xff]  ;;  %v315_v56 = vld [vmem:[#allocation2 + $0x1a8] sm:$0xff]  ;;  %v1150_v57 = vpack.c.bf16 %v284_v50, %v280_v49  ;;  %v310_v59 = vld [vmem:[#allocation2 + $0x180] sm:$0xff]  ;;  %1149 = vmatprep.subr.bf16.mxu1 %v1148_v48  ;;  %p1372_p13 = pneg %p1371_p11 }
  0x45   : > { %1121 = vmatprep.subr.bf16.mxu0 %v1120_v21  ;;  %v1152_v60 = vpack.c.bf16 %v293_v54, %v289_v53  ;;  %v288_v61 = vld [vmem:[#allocation2 + $0xd0] sm:$0xff]  ;;  %v1132_v63 = vpack.c.bf16 %v315_v56, %v311_v55  ;;  %v314_v1 = vld [vmem:[#allocation2 + $0x1a0] sm:$0xff]  ;;  %v297_v2 = vld [vmem:[#allocation2 + $0x118] sm:$0xff]  ;;  %p1378_p5 = por %p1377_p3, %p1376_p1 }
  0x46   : > { %v292_v62 = vld [vmem:[#allocation2 + $0xf0] sm:$0xff]  ;;  %v301_v3 = vld [vmem:[#allocation2 + $0x138] sm:$0xff]  ;;  %v319_v4 = vld [vmem:[#allocation2 + $0x1c8] sm:$0xff]  ;;  %1151 = vmatpush1.bf16.msra.mxu1 %v1150_v57  ;;  %v1134_v7 = vpack.c.bf16 %v314_v1, %v310_v59 }
  0x47   : > { %v323_v5 = vld [vmem:[#allocation2 + $0x1e8] sm:$0xff]  ;;  %v1154_v6 = vpack.c.bf16 %v292_v62, %v288_v61  ;;  %v318_v8 = vld [vmem:[#allocation2 + $0x1c0] sm:$0xff]  ;;  %1153 = vmatprep.subr.bf16.mxu1 %v1152_v60  ;;  %v1156_v9 = vpack.c.bf16 %v301_v3, %v297_v2  ;;  %v296_v10 = vld [vmem:[#allocation2 + $0x110] sm:$0xff]  ;;  %p1379_p6 = pnand %p1378_p5, %p1372_p13 }
  0x48   : > { %1123 = vmatpush1.bf16.msra.mxu0 %v1122_v31  ;;  %v300_v11 = vld [vmem:[#allocation2 + $0x130] sm:$0xff]  ;;  %v1136_v12 = vpack.c.bf16 %v323_v5, %v319_v4  ;;  %v322_v13 = vld [vmem:[#allocation2 + $0x1e0] sm:$0xff]  ;;  %v305_v14 = vld [vmem:[#allocation2 + $0x158] sm:$0xff] }
  0x49   : > { %1125 = vmatprep.subr.bf16.mxu0 %v1124_v37  ;;  %v309_v15 = vld [vmem:[#allocation2 + $0x178] sm:$0xff]  ;;  %v1158_v16 = vpack.c.bf16 %v300_v11, %v296_v10  ;;  %v1138_v17 = vpack.c.bf16 %v322_v13, %v318_v8  ;;  %v304_v19 = vld [vmem:[#allocation2 + $0x150] sm:$0xff]  ;;  %v246_v23 = vld [vmem:[%s1584_s4] sm:$0xff] }
  0x4a   : > { %1155 = vmatpush1.bf16.msra.mxu1 %v1154_v6  ;;  %v1160_v18 = vpack.c.bf16 %v309_v15, %v305_v14  ;;  %v308_v20 = vld [vmem:[#allocation2 + $0x170] sm:$0xff]  ;;  %v313_v21 = vld [vmem:[#allocation2 + $0x198] sm:$0xff]  ;;  %v247_v24 = vld [vmem:[%s1584_s4 + $0x8] sm:$0xff] }
  0x4b   : > { %1157 = vmatprep.subr.bf16.mxu1 %v1156_v9  ;;  %v317_v22 = vld [vmem:[#allocation2 + $0x1b8] sm:$0xff]  ;;  %v245_v25 = vld [vmem:[%s237_s7] sm:$0xff]  ;;  %v1162_v26 = vpack.c.bf16 %v308_v20, %v304_v19  ;;  %v312_v28 = vld [vmem:[#allocation2 + $0x190] sm:$0xff]  ;;  %v1591_v31 = vpack.c.bf16 %v247_v24, %v246_v23 }
  0x4c   : > { %1127 = vmatpush1.bf16.msra.mxu0 %v1126_v46  ;;  %v1164_v27 = vpack.c.bf16 %v317_v22, %v313_v21  ;;  %v316_v29 = vld [vmem:[#allocation2 + $0x1b0] sm:$0xff]  ;;  %v321_v30 = vld [vmem:[#allocation2 + $0x1d8] sm:$0xff]  ;;  %v250_v41 = vld [vmem:[%s1584_s4 + $0x20] sm:$0xff] }
  0x4d   : > { %1129 = vmatprep.subr.bf16.mxu0 %v1128_v51  ;;  %v325_v32 = vld [vmem:[#allocation2 + $0x1f8] sm:$0xff]  ;;  %v248_v34 = vld [vmem:[%s1584_s4 + $0x10] sm:$0xff]  ;;  %v1166_v36 = vpack.c.bf16 %v316_v29, %v312_v28  ;;  %v251_v42 = vld [vmem:[%s1584_s4 + $0x28] sm:$0xff] }
  0x4e   : > { %1159 = vmatpush1.bf16.msra.mxu1 %v1158_v16  ;;  %v249_v35 = vld [vmem:[%s1584_s4 + $0x18] sm:$0xff]  ;;  %v1168_v37 = vpack.c.bf16 %v325_v32, %v321_v30  ;;  %v320_v38 = vld [vmem:[#allocation2 + $0x1d0] sm:$0xff]  ;;  %v1603_v44 = vpack.c.bf16 %v251_v42, %v250_v41  ;;  %v254_v48 = vld [vmem:[%s1584_s4 + $0x40] sm:$0xff] }
  0x4f   : > { %1161 = vmatprep.subr.bf16.mxu1 %v1160_v18  ;;  %v324_v39 = vld [vmem:[#allocation2 + $0x1f0] sm:$0xff]  ;;  %v1597_v40 = vpack.c.bf16 %v249_v35, %v248_v34  ;;  %v253_v46 = vld [vmem:[%s1584_s4 + $0x38] sm:$0xff]  ;;  %v255_v49 = vld [vmem:[%s1584_s4 + $0x48] sm:$0xff] }
  0x50   : > { %1131 = vmatpush1.bf16.msra.mxu0 %v1130_v58  ;;  %v1170_v43 = vpack.c.bf16 %v324_v39, %v320_v38  ;;  %v252_v45 = vld [vmem:[%s1584_s4 + $0x30] sm:$0xff]  ;;  %v1185_v50 = vpack.c.bf16 %v255_v49, %v254_v48  ;;  %v257_v52 = vld [vmem:[%s1584_s4 + $0x58] sm:$0xff]  ;;  %v258_v54 = vld [vmem:[%s1584_s4 + $0x60] sm:$0xff] }
  0x51   : > { %1133 = vmatprep.subr.bf16.mxu0 %v1132_v63  ;;  %v1610_v47 = vpack.c.bf16 %v253_v46, %v252_v45  ;;  %v256_v51 = vld [vmem:[%s1584_s4 + $0x50] sm:$0xff]  ;;  %v259_v55 = vld [vmem:[%s1584_s4 + $0x68] sm:$0xff]  ;;  %v261_v58 = vld [vmem:[%s1584_s4 + $0x78] sm:$0xff] }
  0x52   : > { %1163 = vmatpush1.bf16.msra.mxu1 %v1162_v26  ;;  %v1188_v53 = vpack.c.bf16 %v257_v52, %v256_v51  ;;  %v1191_v56 = vpack.c.bf16 %v259_v55, %v258_v54  ;;  %v260_v57 = vld [vmem:[%s1584_s4 + $0x70] sm:$0xff] }
  0x53   : > { %1165 = vmatprep.subr.bf16.mxu1 %v1164_v27  ;;  %v1194_v59 = vpack.c.bf16 %v261_v58, %v260_v57 }
  0x54   : > { %1135 = vmatpush1.bf16.msra.mxu0 %v1134_v7 }
  0x55   : > { %1137 = vmatprep.subr.bf16.mxu0 %v1136_v12 }
  0x56   : > { %1167 = vmatpush1.bf16.msra.mxu1 %v1166_v36 }
  0x57   : > { %1169 = vmatprep.subr.bf16.mxu1 %v1168_v37 }
  0x58   : > { %1139 = vmatpush1.bf16.msra.mxu0 %v1138_v17 }
  0x59   : > { %1172 = vmatprep.subr.bf16.mxu0 %v1457_v33 }
  0x5a   : > { %1171 = vmatpush1.bf16.msra.mxu1 %v1170_v43 }
  0x5b   : > { %391 = vmatmul.mubr.f32.vlgmr.msra.gmra.mrb[0].mxu0 %v245_v25  ;;  %1196 = vmatprep.subr.bf16.mxu1 %v1457_v33 }
  0x5c   : > { %1174 = vmatpush3.bf16.msra.mxu0 %v1591_v31  ;;  %1000 = vmatprep.mubr.msk.f32.mxu0 %vm1458_vm0, %v1456_v0 }
  0x5d   : > { %1175 = vmatprep.subr.bf16.mxu0 %v1457_v33  ;;  %462 = vmatmul.mubr.f32.vlgmr.msra.gmra.mrb[0].mxu1 %v245_v25 }
  0x5e   : > { %1198 = vmatpush3.bf16.msra.mxu1 %v1591_v31  ;;  %1035 = vmatprep.mubr.msk.f32.mxu1 %vm1458_vm0, %v1456_v0 }
  0x5f   : > { %1199 = vmatprep.subr.bf16.mxu1 %v1457_v33 }
  0x60   : > { %1177 = vmatpush3.bf16.msra.mxu0 %v1597_v40 }
  0x61   : > { %1178 = vmatprep.subr.bf16.mxu0 %v1457_v33 }
  0x62   : > { %1201 = vmatpush3.bf16.msra.mxu1 %v1597_v40 }
  0x63   : > { %1202 = vmatprep.subr.bf16.mxu1 %v1457_v33 }
  0x64   : > { %1180 = vmatpush3.bf16.msra.mxu0 %v1603_v44 }
  0x65   : > { %1181 = vmatprep.subr.bf16.mxu0 %v1457_v33 }
  0x66   : > { %1204 = vmatpush3.bf16.msra.mxu1 %v1603_v44 }
  0x67   : > { %1205 = vmatprep.subr.bf16.mxu1 %v1457_v33 }
  0x68   : > { %1183 = vmatpush3.bf16.msra.mxu0 %v1610_v47 }
  0x69   : > { %1184 = vmatprep.subr.bf16.mxu0 %v1457_v33 }
  0x6a   : > { %1207 = vmatpush3.bf16.msra.mxu1 %v1610_v47 }
  0x6b   : > { %1208 = vmatprep.subr.bf16.mxu1 %v1457_v33 }
  0x6c   : > { %1186 = vmatpush3.bf16.msra.mxu0 %v1185_v50 }
  0x6d   : > { %1187 = vmatprep.subr.bf16.mxu0 %v1457_v33 }
  0x6e   : > { %1210 = vmatpush3.bf16.msra.mxu1 %v1185_v50 }
  0x6f   : > { %1211 = vmatprep.subr.bf16.mxu1 %v1457_v33 }
  0x70   : > { %1189 = vmatpush3.bf16.msra.mxu0 %v1188_v53 }
  0x71   : > { %1190 = vmatprep.subr.bf16.mxu0 %v1457_v33 }
  0x72   : > { %1213 = vmatpush3.bf16.msra.mxu1 %v1188_v53 }
  0x73   : > { %1214 = vmatprep.subr.bf16.mxu1 %v1457_v33 }
  0x74   : > { %1192 = vmatpush3.bf16.msra.mxu0 %v1191_v56 }
  0x75   : > { %1193 = vmatprep.subr.bf16.mxu0 %v1457_v33 }
  0x76   : > { %1216 = vmatpush3.bf16.msra.mxu1 %v1191_v56 }
  0x77   : > { %1217 = vmatprep.subr.bf16.mxu1 %v1457_v33 }
  0x78   : > { %1195 = vmatpush3.bf16.msra.mxu0 %v1194_v59 }
  0x79   : > { %1220 = vmatprep.subr.bf16.mxu0 %v1457_v33 }
  0x7a   : > { %1219 = vmatpush3.bf16.msra.mxu1 %v1194_v59 }
  0x7b   : > { %1244 = vmatprep.subr.bf16.mxu1 %v1457_v33 }
 0x12e   : > { %v392_v60 = vpop.f32.mrb[0].mxu0 }
 0x12f   : > { %v394_v61 = vpop.f32.mrb[1].mxu0  ;;  %1001 = vmatmul.mubr.f32.vlgmr.msra.gmra.mrb[2].mxu0 %v392_v60 }
 0x130   : > { %1222 = vmatpush3.bf16.msra.mxu0 %v1591_v31  ;;  %1036 = vmatmul.mubr.f32.vlgmr.msra.gmra.mrb[2].mxu1 %v394_v61  ;;  %v463_v62 = vpop.f32.mrb[0].mxu1 }
 0x131   : > { %1246 = vmatpush3.bf16.msra.mxu1 %v1591_v31  ;;  %1223 = vmatprep.subr.bf16.mxu0 %v1457_v33  ;;  %v465_v63 = vpop.f32.mrb[1].mxu1 }
 0x132   : > { %1247 = vmatprep.subr.bf16.mxu1 %v1457_v33  ;;  %1070 = vmatprep.mubr.msk.f32.mxu0 %vm1458_vm0, %v1456_v0 }
 0x133   : > { %1105 = vmatprep.mubr.msk.f32.mxu1 %vm1458_vm0, %v1456_v0 }
 0x134   : > { %1225 = vmatpush3.bf16.msra.mxu0 %v1597_v40 }
 0x135   : > { %1249 = vmatpush3.bf16.msra.mxu1 %v1597_v40  ;;  %1226 = vmatprep.subr.bf16.mxu0 %v1457_v33 }
 0x136   : > { %1250 = vmatprep.subr.bf16.mxu1 %v1457_v33 }
 0x138   : > { %1228 = vmatpush3.bf16.msra.mxu0 %v1603_v44 }
 0x139   : > { %1252 = vmatpush3.bf16.msra.mxu1 %v1603_v44  ;;  %1229 = vmatprep.subr.bf16.mxu0 %v1457_v33 }
 0x13a   : > { %1253 = vmatprep.subr.bf16.mxu1 %v1457_v33 }
 0x13c   : > { %1231 = vmatpush3.bf16.msra.mxu0 %v1610_v47 }
 0x13d   : > { %1255 = vmatpush3.bf16.msra.mxu1 %v1610_v47  ;;  %1232 = vmatprep.subr.bf16.mxu0 %v1457_v33 }
 0x13e   : > { %1256 = vmatprep.subr.bf16.mxu1 %v1457_v33 }
 0x140   : > { %1234 = vmatpush3.bf16.msra.mxu0 %v1185_v50 }
 0x141   : > { %1258 = vmatpush3.bf16.msra.mxu1 %v1185_v50  ;;  %1235 = vmatprep.subr.bf16.mxu0 %v1457_v33 }
 0x142   : > { %1259 = vmatprep.subr.bf16.mxu1 %v1457_v33 }
 0x144   : > { %1237 = vmatpush3.bf16.msra.mxu0 %v1188_v53 }
 0x145   : > { %1261 = vmatpush3.bf16.msra.mxu1 %v1188_v53  ;;  %1238 = vmatprep.subr.bf16.mxu0 %v1457_v33 }
 0x146   : > { %1262 = vmatprep.subr.bf16.mxu1 %v1457_v33 }
 0x148   : > { %1240 = vmatpush3.bf16.msra.mxu0 %v1191_v56 }
 0x149   : > { %1264 = vmatpush3.bf16.msra.mxu1 %v1191_v56  ;;  %1241 = vmatprep.subr.bf16.mxu0 %v1457_v33 }
 0x14a   : > { %1265 = vmatprep.subr.bf16.mxu1 %v1457_v33 }
 0x14c   : > { %1243 = vmatpush3.bf16.msra.mxu0 %v1194_v59 }
 0x14d   : > { %1267 = vmatpush3.bf16.msra.mxu1 %v1194_v59 }
 0x14f   : > { %1071 = vmatmul.mubr.f32.vlgmr.msra.gmra.mrb[4].mxu0 %v463_v62 }
 0x150   : > { %1106 = vmatmul.mubr.f32.vlgmr.msra.gmra.mrb[4].mxu1 %v465_v63 }
 0x202   : > { %v534_v0 = vpop.f32.mrb[2].mxu0 }
 0x203   : > { %539 = vst.msk [vmem:[%s230_s10] sm:$0xff] %vm538_vm1, %v534_v0  ;;  %v1002_v1 = vpop.f32.mrb[3].mxu0  ;;  %v606_v2 = vpop.f32.mrb[2].mxu1 }
 0x204   : > { %890 = vst.msk [vmem:[%s230_s10 + $0x8] sm:$0xff] %vm538_vm1, %v606_v2  ;;  %v1037_v3 = vpop.f32.mrb[3].mxu1 }
 0x222   : > { %v678_v4 = vpop.f32.mrb[4].mxu0 }
 0x223   : > { %891 = vst.msk [vmem:[%s230_s10 + $0x10] sm:$0xff] %vm538_vm1, %v678_v4  ;;  %v1072_v5 = vpop.f32.mrb[5].mxu0  ;;  %v750_v6 = vpop.f32.mrb[4].mxu1 }
 0x224   : > { %892 = vst.msk [vmem:[%s230_s10 + $0x18] sm:$0xff] %vm538_vm1, %v750_v6  ;;  %v1107_v7 = vpop.f32.mrb[5].mxu1 }
 0x225   : > { %1382 = shalt.err (!%p1379_p6)
}
 0x226   : > { %s1383_s30 = scalar_lea.hbm %s1674_s23, 512  ;;  %s1387_s6 = scalar_lea.hbm %s1727_s3, 1024 }
 0x227   : > { %p1384_p7 = scmp.ne.s32.totalorder %s1674_s23, %s1383_s30  ;;  %p1388_p0 = scmp.lt.u32.totalorder %s1674_s23, %s1727_s3 }
 0x228   : > { %p1389_p2 = scmp.lt.u32.totalorder %s1387_s6, %s1383_s30  ;;  %p1391_p8 = scmp.lt.u32.totalorder %s1383_s30, %s1674_s23 }
 0x229   : > { %p1385_p9 = pnand %p1384_p7, %p1739_p10 }
 0x22a   : > { %p1390_p4 = por %p1389_p2, %p1388_p0 }
 0x22b   : > { %p1386_p12 = pneg %p1385_p9 }
 0x22c   : > { %p1392_p11 = por %p1391_p8, %p1390_p4 }
 0x22e   : > { %p1393_p13 = pnand %p1392_p11, %p1386_p12 }
 0x230   : > { %1396 = shalt.err (!%p1393_p13)
}
 0x231   : > { %s1460_s9 = smov 128   ;;  %s1461_s10 = smov 8  }
 0x232   : > { %1272 = dma.vmem_to_hbm [thread:$0]  (%p1739_p10), %s1669_s11, 512, %s1674_s23, %s1678_s26, %s1460_s9, %s1460_s9, %s1461_s10  }
 0x233 PF: > { %p1284_p1 = scmp.ge.s32.totalorder %s1451_s17, 2  ;;  %s788_s18 = sand.u32 1, %s1431_s12  }
 0x234   : > { %p1740_p3 = scmp.ne.s32.totalorder %s1733_s24, 0  ;;  %s789_s19 = scalar_lea.sflag [#allocation4], %s788_s18 }
 0x236   : > { %p1279_p5 = pnand %p1284_p1, %p1740_p3 }
 0x238   : > { %1426 = dma.done.wait (!%p1279_p5), %s789_s19, 512  }
 0x239   : > { %1428 = vsyncadd (!%p1279_p5), %s789_s19, 4294966784  ;;  %s17_s17 = sadd.s32 1, %s1451_s17   ;;  %s1741_s12 = smov %s1435_s13 }
 0x23a   : > { %p14_p6 = scmp.ge.s32.totalorder %s17_s17, 4   ;;  %s1742_s13 = smov %s1439_s14 }
 0x23b   : > { %s1743_s14 = smov %s1535_s25  ;;  %s1744_s15 = smov %s1447_s16 }
 0x23c   : > { %s1745_s16 = smov %s1747_s20  ;;  %16 = sbr.rel (!%p14_p6) target bundleno = 5 (0x5), region = 79 }
 0x243   :  { %794 = vsyncpa [#allocation3], 1 }
 0x244   :  { %796 = vsyncpa [#allocation3 + $0x1], 1 }
 0x245   :  { %797 = vsyncpa [#allocation4], 1 }
 0x246   :  { %799 = vsyncpa [#allocation4 + $0x1], 1 }

</bundles_post_ra>
